<compile_context>
chip_gen: v6e
topology: v6e:2x2x1
jax: 0.10.0
libtpu: 0.0.40
codegen_flags: <defaults>
</compile_context>

<pallas_src>
import functools

import jax
import jax.numpy as jnp
from jax.experimental import pallas as pl
from jax.experimental.pallas import tpu as pltpu


_LANE = 128
_NEG_BIG = -1e9   # fill value for padded logit lanes; exp() underflows to 0


def _round_up(x, m):
    return (x + m - 1) // m * m


def _rnn_seq_kernel(zx_ref, h0_ref, wh_ref, out_ref, h_final_ref, h_scratch,
                    *, tt, h_pad, compute_dtype):
    """One batch block x one time chunk.

    zx_ref:      (tt, block_b, H_pad + O_pad)  precomputed x@Wx + b (f32)
    h0_ref:      (block_b, H_pad)
    wh_ref:      (H_pad, H_pad + O_pad)        hidden -> fused (h | o) weights
    out_ref:     (tt, block_b, O_pad)          log-softmax outputs
    h_final_ref: (block_b, H_pad)              final hidden (written once)
    h_scratch:   (block_b, H_pad) f32          lane-padded recurrent carry
    """
    tc = pl.program_id(1)

    # Seed the VMEM-resident carry at the first time chunk of this batch block.
    @pl.when(tc == 0)
    def _():
        h_scratch[...] = h0_ref[...]

    wh = wh_ref[...]

    # Statically unrolled inner time loop (tt is kept small by construction).
    for i in range(tt):
        h = h_scratch[...]
        # Serial critical path per step: a single (block_b, H_pad) x
        # (H_pad, H_pad+O_pad) MXU pass; the x-projection was hoisted outside.
        z = jnp.dot(h.astype(compute_dtype), wh,
                    preferred_element_type=jnp.float32) + zx_ref[i]
        new_h = z[:, :h_pad]           # lane-aligned split (h_pad % 128 == 0)
        logits = z[:, h_pad:]

        # log_softmax in f32 on VPU/EUP; padded lanes hold ~-1e9 -> exp == 0.
        m = jnp.max(logits, axis=1, keepdims=True)
        shifted = logits - m
        lse = jnp.log(jnp.sum(jnp.exp(shifted), axis=1, keepdims=True))

        out_ref[i] = (shifted - lse).astype(out_ref.dtype)
        h_scratch[...] = new_h

    # Write the carried hidden state back only once (last time chunk).
    @pl.when(tc == pl.num_programs(1) - 1)
    def _():
        h_final_ref[...] = h_scratch[...]


def prepare_params(w_i2h, b_i2h, w_i2o, b_i2o, input_size):
    """One-time weight re-layout (hoisted out of the recurrence).

    PyTorch layout in:  w_i2h (H, I+H), w_i2o (O, I+H), b_* (H,) / (O,).
    Returns lane-padded, MXU-friendly fused layout:
      wx (I, H_pad+O_pad), wh (H_pad, H_pad+O_pad), b (1, H_pad+O_pad).
    Padded hidden lanes are zero; padded logit lanes get -1e9 via the bias so
    the in-kernel log_softmax ignores them for free.
    """
    H, O = w_i2h.shape[0], w_i2o.shape[0]
    I = input_size
    H_pad, O_pad = _round_up(H, _LANE), _round_up(O, _LANE)

    w_full = jnp.concatenate([w_i2h.T, w_i2o.T], axis=1)       # (I+H, H+O)

    def pad_cols(w):
        return jnp.concatenate(
            [jnp.pad(w[:, :H], ((0, 0), (0, H_pad - H))),
             jnp.pad(w[:, H:], ((0, 0), (0, O_pad - O)))], axis=1)

    wx = pad_cols(w_full[:I])                                   # (I, H_pad+O_pad)
    wh = jnp.pad(pad_cols(w_full[I:]), ((0, H_pad - H), (0, 0)))  # (H_pad, ...)
    b = jnp.concatenate(
        [jnp.pad(b_i2h, (0, H_pad - H)),
         jnp.pad(b_i2o, (0, O_pad - O), constant_values=_NEG_BIG)])[None, :]
    return wx, wh, b


def _choose_batch_block(B):
    # Prefer >= 2 parallel batch blocks (v7x has 2 TensorCores per chip) with
    # block_b a multiple of 8 sublanes, capped at 256 rows per MXU pass.
    if B % 16 == 0:
        nb = 2
        while B // nb > 256 and B % (nb * 2 * 8) == 0:
            nb *= 2
        return nb, B // nb
    # Full-dim block is exempt from the (8,128) rule; disables batch sharding
    # and wastes sublanes, but stays correct for odd batch sizes.
    return 1, B


def _choose_time_chunk(T, block_b, zo_lanes, max_unroll=32, budget_bytes=2 << 20):
    # Largest divisor of T whose per-chunk zx + out blocks fit the VMEM budget
    # and whose static unroll stays modest.
    per_step = 4 * block_b * zo_lanes
    tt = max(1, min(T, max_unroll, budget_bytes // max(per_step, 1)))
    while T % tt:
        tt -= 1
    return tt


@functools.partial(jax.jit, static_argnames=("output_size", "compute_dtype"))
def rnn_sequence_forward(xs, h0, wx, wh, b, *, output_size,
                         compute_dtype=jnp.float32):
    """Run the RNN cell over a whole sequence with the recurrence in one kernel.

    xs: (T, B, input_size), h0: (B, hidden_size); wx/wh/b from prepare_params.
    Returns (log_softmax outputs (T, B, output_size), final hidden (B, H)).
    """
    T, B, _ = xs.shape
    H = h0.shape[1]
    H_pad, HO_pad = wh.shape
    O_pad = HO_pad - H_pad
    O = output_size

    # (1) Hoisted x-projection: one big high-utilization matmul for the whole
    # sequence (independent across time), f32 accumulation.
    zx = jnp.einsum("tbi,ij->tbj", xs.astype(compute_dtype),
                    wx.astype(compute_dtype),
                    preferred_element_type=jnp.float32) + b     # (T, B, HO_pad)

    h0_p = jnp.pad(h0.astype(jnp.float32), ((0, 0), (0, H_pad - H)))
    wh_c = wh.astype(compute_dtype)

    nb, block_b = _choose_batch_block(B)
    tt = _choose_time_chunk(T, block_b, HO_pad + O_pad)
    grid = (nb, T // tt)                                        # time innermost

    kernel = functools.partial(_rnn_seq_kernel, tt=tt, h_pad=H_pad,
                               compute_dtype=compute_dtype)

    out_p, h_final_p = pl.pallas_call(
        kernel,
        out_shape=(
            jax.ShapeDtypeStruct((T, B, O_pad), jnp.float32),
            jax.ShapeDtypeStruct((B, H_pad), jnp.float32),
        ),
        grid_spec=pltpu.PrefetchScalarGridSpec(
            num_scalar_prefetch=0,
            grid=grid,
            in_specs=[
                pl.BlockSpec((tt, block_b, HO_pad), lambda bb, tc: (tc, bb, 0)),
                pl.BlockSpec((block_b, H_pad), lambda bb, tc: (bb, 0)),
                pl.BlockSpec((H_pad, HO_pad), lambda bb, tc: (0, 0)),  # resident
            ],
            out_specs=(
                pl.BlockSpec((tt, block_b, O_pad), lambda bb, tc: (tc, bb, 0)),
                pl.BlockSpec((block_b, H_pad), lambda bb, tc: (bb, 0)),  # carry
            ),
            scratch_shapes=[pltpu.VMEM((block_b, H_pad), jnp.float32)],
        ),
        compiler_params=pltpu.CompilerParams(
            dimension_semantics=("parallel", "arbitrary")),
    )(zx, h0_p, wh_c)

    return out_p[:, :, :O], h_final_p[:, :H]


def rnn_forward(x, h, wx, wh, b, *, output_size, compute_dtype=jnp.float32):
    """Single cell step, identical to the PyTorch module's forward().
    x: (N, input_size), h: (N, hidden_size)."""
    out_seq, h_new = rnn_sequence_forward(x[None], h, wx, wh, b,
                                          output_size=output_size,
                                          compute_dtype=compute_dtype)
    return out_seq[0], h_new


def init_linear_params(key, in_features, out_features):
    # Matches nn.Linear default init: U(-1/sqrt(fan_in), 1/sqrt(fan_in))
    kw, kb = jax.random.split(key)
    bound = 1.0 / (in_features ** 0.5)
    w = jax.random.uniform(kw, (out_features, in_features), jnp.float32,
                           minval=-bound, maxval=bound)
    b = jax.random.uniform(kb, (out_features,), jnp.float32,
                           minval=-bound, maxval=bound)
    return w, b


def ref_sequence(xs, h0, w_i2h, b_i2h, w_i2o, b_i2o):
    def step(h, x):
        combined = jnp.concatenate([x, h], axis=1)
        new_h = combined @ w_i2h.T + b_i2h
        logits = combined @ w_i2o.T + b_i2o
        return new_h, jax.nn.log_softmax(logits, axis=1)
    hT, outs = jax.lax.scan(step, h0, xs)
    return outs, hT


if __name__ == "__main__":
    input_size, hidden_size, output_size = 16, 32, 16
    T, B = 12, 16          # sequence length, independent sequences (batch)

    key = jax.random.PRNGKey(0)
    k_x, k_i2h, k_i2o = jax.random.split(key, 3)

    xs = jax.random.normal(k_x, (T, B, input_size), jnp.float32)
    h0 = jnp.zeros((B, hidden_size), jnp.float32)       # init_hidden()

    w_i2h, b_i2h = init_linear_params(k_i2h, input_size + hidden_size, hidden_size)
    w_i2o, b_i2o = init_linear_params(k_i2o, input_size + hidden_size, output_size)

    # One-time weight re-layout (split + fuse + transpose + lane-pad).
    wx, wh, b = prepare_params(w_i2h, b_i2h, w_i2o, b_i2o, input_size)

    ref_out, ref_hT = ref_sequence(xs, h0, w_i2h, b_i2h, w_i2o, b_i2o)

    # Whole-sequence kernel, f32 matmul operands (tight check).
    out, hT = rnn_sequence_forward(xs, h0, wx, wh, b, output_size=output_size)
    jax.block_until_ready((out, hT))
    assert jnp.allclose(out, ref_out, atol=1e-4), "sequence output mismatch"
    assert jnp.allclose(hT, ref_hT, atol=1e-4), "final hidden mismatch"

    # Single-step path: exactly the PyTorch module's forward(input, hidden).
    x1 = xs[0]
    out1, h1 = rnn_forward(x1, h0, wx, wh, b, output_size=output_size)
    jax.block_until_ready((out1, h1))
    combined = jnp.concatenate([x1, h0], axis=1)
    ref_h1 = combined @ w_i2h.T + b_i2h
    ref_out1 = jax.nn.log_softmax(combined @ w_i2o.T + b_i2o, axis=1)
    assert jnp.allclose(out1, ref_out1, atol=1e-4), "single-step output mismatch"
    assert jnp.allclose(h1, ref_h1, atol=1e-4), "single-step hidden mismatch"

    # bf16 MXU operands (v5e/v6e recommendation): f32 accumulation + f32
    # softmax; loose tolerance — precision tradeoff, not a bug.
    out_bf, hT_bf = rnn_sequence_forward(xs, h0, wx, wh, b,
                                         output_size=output_size,
                                         compute_dtype=jnp.bfloat16)
    jax.block_until_ready((out_bf, hT_bf))
    assert jnp.allclose(out_bf, ref_out, atol=0.5), "bf16 output diverged"
    assert jnp.allclose(hT_bf, ref_hT, atol=0.5), "bf16 hidden diverged"

    print("KERNEL_OK")
</pallas_src>

<mosaic_0001>
module attributes {stable_mosaic.version = 11 : i64} {
  func.func @_rnn_seq_kernel(%arg0: i32, %arg1: i32, %arg2: memref<12x8x256xf32, #tpu.memory_space<vmem>>, %arg3: memref<8x128xf32, #tpu.memory_space<vmem>>, %arg4: memref<128x256xf32, #tpu.memory_space<vmem>>, %arg5: memref<12x8x128xf32, #tpu.memory_space<vmem>>, %arg6: memref<8x128xf32, #tpu.memory_space<vmem>>, %arg7: memref<8x128xf32, #tpu.memory_space<vmem>>) attributes {dimension_semantics = [#tpu.dimension_semantics<parallel>, #tpu.dimension_semantics<arbitrary>], iteration_bounds = array<i64: 2, 1>, scalar_prefetch = 0 : i64, scratch_operands = 1 : i64, tpu.core_type = #tpu.core_type<tc>, window_params = [{transform_indices = @transform_0, window_bounds = array<i64: 12, 8, 256>}, {transform_indices = @transform_1, window_bounds = array<i64: 8, 128>}, {pipeline_mode = #tpu.pipeline_mode<synchronous>, transform_indices = @transform_2, window_bounds = array<i64: 128, 256>}, {transform_indices = @transform_3, window_bounds = array<i64: 12, 8, 128>}, {transform_indices = @transform_4, window_bounds = array<i64: 8, 128>}]} {
    %c0_i32 = arith.constant 0 : i32
    %0 = arith.cmpi eq, %arg1, %c0_i32 : i32
    %1 = arith.extui %0 : i1 to i32
    %c0_i32_0 = arith.constant 0 : i32
    %2 = arith.cmpi ne, %1, %c0_i32_0 : i32
    scf.if %2 {
      %c0_148 = arith.constant 0 : index
      %c0_149 = arith.constant 0 : index
      %259 = vector.load %arg3[%c0_148, %c0_149] : memref<8x128xf32, #tpu.memory_space<vmem>>, vector<8x128xf32>
      %c0_150 = arith.constant 0 : index
      %c0_151 = arith.constant 0 : index
      %260 = vector.load %arg7[%c0_150, %c0_151] : memref<8x128xf32, #tpu.memory_space<vmem>>, vector<8x128xf32>
      tpu.vector_store %arg7[%c0_150, %c0_151], %259 {strides = array<i32>} : memref<8x128xf32, #tpu.memory_space<vmem>>, vector<8x128xf32>,
    } else {
    }
    %c0 = arith.constant 0 : index
    %c0_1 = arith.constant 0 : index
    %3 = vector.load %arg4[%c0, %c0_1] : memref<128x256xf32, #tpu.memory_space<vmem>>, vector<128x256xf32>
    %c0_2 = arith.constant 0 : index
    %c0_3 = arith.constant 0 : index
    %4 = vector.load %arg7[%c0_2, %c0_3] : memref<8x128xf32, #tpu.memory_space<vmem>>, vector<8x128xf32>
    %cst = arith.constant dense<0.000000e+00> : vector<8x256xf32>
    %5 = tpu.matmul %4, %3, %cst {dimension_numbers = #tpu.dot_dimension_numbers<[1], [0], [0], [1], [0, 0, 1, 1], [], []>} : vector<8x128xf32>, vector<128x256xf32>, vector<8x256xf32> -> vector<8x256xf32>
    %c0_4 = arith.constant 0 : index
    %c0_5 = arith.constant 0 : index
    %c0_6 = arith.constant 0 : index
    %6 = vector.load %arg2[%c0_4, %c0_5, %c0_6] : memref<12x8x256xf32, #tpu.memory_space<vmem>>, vector<1x8x256xf32>
    %7 = vector.shape_cast %6 : vector<1x8x256xf32> to vector<8x256xf32>
    %8 = arith.addf %5, %7 : vector<8x256xf32>
    %9 = vector.extract_strided_slice %8 {offsets = [0, 0], sizes = [8, 128], strides = [1, 1]} : vector<8x256xf32> to vector<8x128xf32>
    %10 = vector.extract_strided_slice %8 {offsets = [0, 128], sizes = [8, 128], strides = [1, 1]} : vector<8x256xf32> to vector<8x128xf32>
    %cst_7 = arith.constant dense<0xFF800000> : vector<8xf32>
    %11 = vector.multi_reduction <maximumf>, %10, %cst_7 [1] : vector<8x128xf32> to vector<8xf32>
    %12 = vector.shape_cast %11 : vector<8xf32> to vector<8x1xf32>
    %13 = vector.broadcast %12 : vector<8x1xf32> to vector<8x128xf32>
    %14 = arith.subf %10, %13 : vector<8x128xf32>
    %15 = math.exp %14 : vector<8x128xf32>
    %cst_8 = arith.constant dense<0.000000e+00> : vector<8xf32>
    %16 = vector.multi_reduction <add>, %15, %cst_8 [1] : vector<8x128xf32> to vector<8xf32>
    %17 = vector.shape_cast %16 : vector<8xf32> to vector<8x1xf32>
    %18 = math.log %17 : vector<8x1xf32>
    %19 = vector.broadcast %18 : vector<8x1xf32> to vector<8x128xf32>
    %20 = arith.subf %14, %19 : vector<8x128xf32>
    %c0_9 = arith.constant 0 : index
    %c0_10 = arith.constant 0 : index
    %c0_11 = arith.constant 0 : index
    %21 = vector.load %arg5[%c0_9, %c0_10, %c0_11] : memref<12x8x128xf32, #tpu.memory_space<vmem>>, vector<1x8x128xf32>
    %22 = vector.shape_cast %21 : vector<1x8x128xf32> to vector<8x128xf32>
    %23 = vector.shape_cast %20 : vector<8x128xf32> to vector<1x8x128xf32>
    tpu.vector_store %arg5[%c0_9, %c0_10, %c0_11], %23 {strides = array<i32>} : memref<12x8x128xf32, #tpu.memory_space<vmem>>, vector<1x8x128xf32>,
    %c0_12 = arith.constant 0 : index
    %c0_13 = arith.constant 0 : index
    %24 = vector.load %arg7[%c0_12, %c0_13] : memref<8x128xf32, #tpu.memory_space<vmem>>, vector<8x128xf32>
    tpu.vector_store %arg7[%c0_12, %c0_13], %9 {strides = array<i32>} : memref<8x128xf32, #tpu.memory_space<vmem>>, vector<8x128xf32>,
    %c0_14 = arith.constant 0 : index
    %c0_15 = arith.constant 0 : index
    %25 = vector.load %arg7[%c0_14, %c0_15] : memref<8x128xf32, #tpu.memory_space<vmem>>, vector<8x128xf32>
    %cst_16 = arith.constant dense<0.000000e+00> : vector<8x256xf32>
    %26 = tpu.matmul %25, %3, %cst_16 {dimension_numbers = #tpu.dot_dimension_numbers<[1], [0], [0], [1], [0, 0, 1, 1], [], []>} : vector<8x128xf32>, vector<128x256xf32>, vector<8x256xf32> -> vector<8x256xf32>
    %c1 = arith.constant 1 : index
    %c0_17 = arith.constant 0 : index
    %c0_18 = arith.constant 0 : index
    %27 = vector.load %arg2[%c1, %c0_17, %c0_18] : memref<12x8x256xf32, #tpu.memory_space<vmem>>, vector<1x8x256xf32>
    %28 = vector.shape_cast %27 : vector<1x8x256xf32> to vector<8x256xf32>
    %29 = arith.addf %26, %28 : vector<8x256xf32>
    %30 = vector.extract_strided_slice %29 {offsets = [0, 0], sizes = [8, 128], strides = [1, 1]} : vector<8x256xf32> to vector<8x128xf32>
    %31 = vector.extract_strided_slice %29 {offsets = [0, 128], sizes = [8, 128], strides = [1, 1]} : vector<8x256xf32> to vector<8x128xf32>
    %cst_19 = arith.constant dense<0xFF800000> : vector<8xf32>
    %32 = vector.multi_reduction <maximumf>, %31, %cst_19 [1] : vector<8x128xf32> to vector<8xf32>
    %33 = vector.shape_cast %32 : vector<8xf32> to vector<8x1xf32>
    %34 = vector.broadcast %33 : vector<8x1xf32> to vector<8x128xf32>
    %35 = arith.subf %31, %34 : vector<8x128xf32>
    %36 = math.exp %35 : vector<8x128xf32>
    %cst_20 = arith.constant dense<0.000000e+00> : vector<8xf32>
    %37 = vector.multi_reduction <add>, %36, %cst_20 [1] : vector<8x128xf32> to vector<8xf32>
    %38 = vector.shape_cast %37 : vector<8xf32> to vector<8x1xf32>
    %39 = math.log %38 : vector<8x1xf32>
    %40 = vector.broadcast %39 : vector<8x1xf32> to vector<8x128xf32>
    %41 = arith.subf %35, %40 : vector<8x128xf32>
    %c1_21 = arith.constant 1 : index
    %c0_22 = arith.constant 0 : index
    %c0_23 = arith.constant 0 : index
    %42 = vector.load %arg5[%c1_21, %c0_22, %c0_23] : memref<12x8x128xf32, #tpu.memory_space<vmem>>, vector<1x8x128xf32>
    %43 = vector.shape_cast %42 : vector<1x8x128xf32> to vector<8x128xf32>
    %44 = vector.shape_cast %41 : vector<8x128xf32> to vector<1x8x128xf32>
    tpu.vector_store %arg5[%c1_21, %c0_22, %c0_23], %44 {strides = array<i32>} : memref<12x8x128xf32, #tpu.memory_space<vmem>>, vector<1x8x128xf32>,
    %c0_24 = arith.constant 0 : index
    %c0_25 = arith.constant 0 : index
    %45 = vector.load %arg7[%c0_24, %c0_25] : memref<8x128xf32, #tpu.memory_space<vmem>>, vector<8x128xf32>
    tpu.vector_store %arg7[%c0_24, %c0_25], %30 {strides = array<i32>} : memref<8x128xf32, #tpu.memory_space<vmem>>, vector<8x128xf32>,
    %c0_26 = arith.constant 0 : index
    %c0_27 = arith.constant 0 : index
    %46 = vector.load %arg7[%c0_26, %c0_27] : memref<8x128xf32, #tpu.memory_space<vmem>>, vector<8x128xf32>
    %cst_28 = arith.constant dense<0.000000e+00> : vector<8x256xf32>
    %47 = tpu.matmul %46, %3, %cst_28 {dimension_numbers = #tpu.dot_dimension_numbers<[1], [0], [0], [1], [0, 0, 1, 1], [], []>} : vector<8x128xf32>, vector<128x256xf32>, vector<8x256xf32> -> vector<8x256xf32>
    %c2 = arith.constant 2 : index
    %c0_29 = arith.constant 0 : index
    %c0_30 = arith.constant 0 : index
    %48 = vector.load %arg2[%c2, %c0_29, %c0_30] : memref<12x8x256xf32, #tpu.memory_space<vmem>>, vector<1x8x256xf32>
    %49 = vector.shape_cast %48 : vector<1x8x256xf32> to vector<8x256xf32>
    %50 = arith.addf %47, %49 : vector<8x256xf32>
    %51 = vector.extract_strided_slice %50 {offsets = [0, 0], sizes = [8, 128], strides = [1, 1]} : vector<8x256xf32> to vector<8x128xf32>
    %52 = vector.extract_strided_slice %50 {offsets = [0, 128], sizes = [8, 128], strides = [1, 1]} : vector<8x256xf32> to vector<8x128xf32>
    %cst_31 = arith.constant dense<0xFF800000> : vector<8xf32>
    %53 = vector.multi_reduction <maximumf>, %52, %cst_31 [1] : vector<8x128xf32> to vector<8xf32>
    %54 = vector.shape_cast %53 : vector<8xf32> to vector<8x1xf32>
    %55 = vector.broadcast %54 : vector<8x1xf32> to vector<8x128xf32>
    %56 = arith.subf %52, %55 : vector<8x128xf32>
    %57 = math.exp %56 : vector<8x128xf32>
    %cst_32 = arith.constant dense<0.000000e+00> : vector<8xf32>
    %58 = vector.multi_reduction <add>, %57, %cst_32 [1] : vector<8x128xf32> to vector<8xf32>
    %59 = vector.shape_cast %58 : vector<8xf32> to vector<8x1xf32>
    %60 = math.log %59 : vector<8x1xf32>
    %61 = vector.broadcast %60 : vector<8x1xf32> to vector<8x128xf32>
    %62 = arith.subf %56, %61 : vector<8x128xf32>
    %c2_33 = arith.constant 2 : index
    %c0_34 = arith.constant 0 : index
    %c0_35 = arith.constant 0 : index
    %63 = vector.load %arg5[%c2_33, %c0_34, %c0_35] : memref<12x8x128xf32, #tpu.memory_space<vmem>>, vector<1x8x128xf32>
    %64 = vector.shape_cast %63 : vector<1x8x128xf32> to vector<8x128xf32>
    %65 = vector.shape_cast %62 : vector<8x128xf32> to vector<1x8x128xf32>
    tpu.vector_store %arg5[%c2_33, %c0_34, %c0_35], %65 {strides = array<i32>} : memref<12x8x128xf32, #tpu.memory_space<vmem>>, vector<1x8x128xf32>,
    %c0_36 = arith.constant 0 : index
    %c0_37 = arith.constant 0 : index
    %66 = vector.load %arg7[%c0_36, %c0_37] : memref<8x128xf32, #tpu.memory_space<vmem>>, vector<8x128xf32>
    tpu.vector_store %arg7[%c0_36, %c0_37], %51 {strides = array<i32>} : memref<8x128xf32, #tpu.memory_space<vmem>>, vector<8x128xf32>,
    %c0_38 = arith.constant 0 : index
    %c0_39 = arith.constant 0 : index
    %67 = vector.load %arg7[%c0_38, %c0_39] : memref<8x128xf32, #tpu.memory_space<vmem>>, vector<8x128xf32>
    %cst_40 = arith.constant dense<0.000000e+00> : vector<8x256xf32>
    %68 = tpu.matmul %67, %3, %cst_40 {dimension_numbers = #tpu.dot_dimension_numbers<[1], [0], [0], [1], [0, 0, 1, 1], [], []>} : vector<8x128xf32>, vector<128x256xf32>, vector<8x256xf32> -> vector<8x256xf32>
    %c3 = arith.constant 3 : index
    %c0_41 = arith.constant 0 : index
    %c0_42 = arith.constant 0 : index
    %69 = vector.load %arg2[%c3, %c0_41, %c0_42] : memref<12x8x256xf32, #tpu.memory_space<vmem>>, vector<1x8x256xf32>
    %70 = vector.shape_cast %69 : vector<1x8x256xf32> to vector<8x256xf32>
    %71 = arith.addf %68, %70 : vector<8x256xf32>
    %72 = vector.extract_strided_slice %71 {offsets = [0, 0], sizes = [8, 128], strides = [1, 1]} : vector<8x256xf32> to vector<8x128xf32>
    %73 = vector.extract_strided_slice %71 {offsets = [0, 128], sizes = [8, 128], strides = [1, 1]} : vector<8x256xf32> to vector<8x128xf32>
    %cst_43 = arith.constant dense<0xFF800000> : vector<8xf32>
    %74 = vector.multi_reduction <maximumf>, %73, %cst_43 [1] : vector<8x128xf32> to vector<8xf32>
    %75 = vector.shape_cast %74 : vector<8xf32> to vector<8x1xf32>
    %76 = vector.broadcast %75 : vector<8x1xf32> to vector<8x128xf32>
    %77 = arith.subf %73, %76 : vector<8x128xf32>
    %78 = math.exp %77 : vector<8x128xf32>
    %cst_44 = arith.constant dense<0.000000e+00> : vector<8xf32>
    %79 = vector.multi_reduction <add>, %78, %cst_44 [1] : vector<8x128xf32> to vector<8xf32>
    %80 = vector.shape_cast %79 : vector<8xf32> to vector<8x1xf32>
    %81 = math.log %80 : vector<8x1xf32>
    %82 = vector.broadcast %81 : vector<8x1xf32> to vector<8x128xf32>
    %83 = arith.subf %77, %82 : vector<8x128xf32>
    %c3_45 = arith.constant 3 : index
    %c0_46 = arith.constant 0 : index
    %c0_47 = arith.constant 0 : index
    %84 = vector.load %arg5[%c3_45, %c0_46, %c0_47] : memref<12x8x128xf32, #tpu.memory_space<vmem>>, vector<1x8x128xf32>
    %85 = vector.shape_cast %84 : vector<1x8x128xf32> to vector<8x128xf32>
    %86 = vector.shape_cast %83 : vector<8x128xf32> to vector<1x8x128xf32>
    tpu.vector_store %arg5[%c3_45, %c0_46, %c0_47], %86 {strides = array<i32>} : memref<12x8x128xf32, #tpu.memory_space<vmem>>, vector<1x8x128xf32>,
    %c0_48 = arith.constant 0 : index
    %c0_49 = arith.constant 0 : index
    %87 = vector.load %arg7[%c0_48, %c0_49] : memref<8x128xf32, #tpu.memory_space<vmem>>, vector<8x128xf32>
    tpu.vector_store %arg7[%c0_48, %c0_49], %72 {strides = array<i32>} : memref<8x128xf32, #tpu.memory_space<vmem>>, vector<8x128xf32>,
    %c0_50 = arith.constant 0 : index
    %c0_51 = arith.constant 0 : index
    %88 = vector.load %arg7[%c0_50, %c0_51] : memref<8x128xf32, #tpu.memory_space<vmem>>, vector<8x128xf32>
    %cst_52 = arith.constant dense<0.000000e+00> : vector<8x256xf32>
    %89 = tpu.matmul %88, %3, %cst_52 {dimension_numbers = #tpu.dot_dimension_numbers<[1], [0], [0], [1], [0, 0, 1, 1], [], []>} : vector<8x128xf32>, vector<128x256xf32>, vector<8x256xf32> -> vector<8x256xf32>
    %c4 = arith.constant 4 : index
    %c0_53 = arith.constant 0 : index
    %c0_54 = arith.constant 0 : index
    %90 = vector.load %arg2[%c4, %c0_53, %c0_54] : memref<12x8x256xf32, #tpu.memory_space<vmem>>, vector<1x8x256xf32>
    %91 = vector.shape_cast %90 : vector<1x8x256xf32> to vector<8x256xf32>
    %92 = arith.addf %89, %91 : vector<8x256xf32>
    %93 = vector.extract_strided_slice %92 {offsets = [0, 0], sizes = [8, 128], strides = [1, 1]} : vector<8x256xf32> to vector<8x128xf32>
    %94 = vector.extract_strided_slice %92 {offsets = [0, 128], sizes = [8, 128], strides = [1, 1]} : vector<8x256xf32> to vector<8x128xf32>
    %cst_55 = arith.constant dense<0xFF800000> : vector<8xf32>
    %95 = vector.multi_reduction <maximumf>, %94, %cst_55 [1] : vector<8x128xf32> to vector<8xf32>
    %96 = vector.shape_cast %95 : vector<8xf32> to vector<8x1xf32>
    %97 = vector.broadcast %96 : vector<8x1xf32> to vector<8x128xf32>
    %98 = arith.subf %94, %97 : vector<8x128xf32>
    %99 = math.exp %98 : vector<8x128xf32>
    %cst_56 = arith.constant dense<0.000000e+00> : vector<8xf32>
    %100 = vector.multi_reduction <add>, %99, %cst_56 [1] : vector<8x128xf32> to vector<8xf32>
    %101 = vector.shape_cast %100 : vector<8xf32> to vector<8x1xf32>
    %102 = math.log %101 : vector<8x1xf32>
    %103 = vector.broadcast %102 : vector<8x1xf32> to vector<8x128xf32>
    %104 = arith.subf %98, %103 : vector<8x128xf32>
    %c4_57 = arith.constant 4 : index
    %c0_58 = arith.constant 0 : index
    %c0_59 = arith.constant 0 : index
    %105 = vector.load %arg5[%c4_57, %c0_58, %c0_59] : memref<12x8x128xf32, #tpu.memory_space<vmem>>, vector<1x8x128xf32>
    %106 = vector.shape_cast %105 : vector<1x8x128xf32> to vector<8x128xf32>
    %107 = vector.shape_cast %104 : vector<8x128xf32> to vector<1x8x128xf32>
    tpu.vector_store %arg5[%c4_57, %c0_58, %c0_59], %107 {strides = array<i32>} : memref<12x8x128xf32, #tpu.memory_space<vmem>>, vector<1x8x128xf32>,
    %c0_60 = arith.constant 0 : index
    %c0_61 = arith.constant 0 : index
    %108 = vector.load %arg7[%c0_60, %c0_61] : memref<8x128xf32, #tpu.memory_space<vmem>>, vector<8x128xf32>
    tpu.vector_store %arg7[%c0_60, %c0_61], %93 {strides = array<i32>} : memref<8x128xf32, #tpu.memory_space<vmem>>, vector<8x128xf32>,
    %c0_62 = arith.constant 0 : index
    %c0_63 = arith.constant 0 : index
    %109 = vector.load %arg7[%c0_62, %c0_63] : memref<8x128xf32, #tpu.memory_space<vmem>>, vector<8x128xf32>
    %cst_64 = arith.constant dense<0.000000e+00> : vector<8x256xf32>
    %110 = tpu.matmul %109, %3, %cst_64 {dimension_numbers = #tpu.dot_dimension_numbers<[1], [0], [0], [1], [0, 0, 1, 1], [], []>} : vector<8x128xf32>, vector<128x256xf32>, vector<8x256xf32> -> vector<8x256xf32>
    %c5 = arith.constant 5 : index
    %c0_65 = arith.constant 0 : index
    %c0_66 = arith.constant 0 : index
    %111 = vector.load %arg2[%c5, %c0_65, %c0_66] : memref<12x8x256xf32, #tpu.memory_space<vmem>>, vector<1x8x256xf32>
    %112 = vector.shape_cast %111 : vector<1x8x256xf32> to vector<8x256xf32>
    %113 = arith.addf %110, %112 : vector<8x256xf32>
    %114 = vector.extract_strided_slice %113 {offsets = [0, 0], sizes = [8, 128], strides = [1, 1]} : vector<8x256xf32> to vector<8x128xf32>
    %115 = vector.extract_strided_slice %113 {offsets = [0, 128], sizes = [8, 128], strides = [1, 1]} : vector<8x256xf32> to vector<8x128xf32>
    %cst_67 = arith.constant dense<0xFF800000> : vector<8xf32>
    %116 = vector.multi_reduction <maximumf>, %115, %cst_67 [1] : vector<8x128xf32> to vector<8xf32>
    %117 = vector.shape_cast %116 : vector<8xf32> to vector<8x1xf32>
    %118 = vector.broadcast %117 : vector<8x1xf32> to vector<8x128xf32>
    %119 = arith.subf %115, %118 : vector<8x128xf32>
    %120 = math.exp %119 : vector<8x128xf32>
    %cst_68 = arith.constant dense<0.000000e+00> : vector<8xf32>
    %121 = vector.multi_reduction <add>, %120, %cst_68 [1] : vector<8x128xf32> to vector<8xf32>
    %122 = vector.shape_cast %121 : vector<8xf32> to vector<8x1xf32>
    %123 = math.log %122 : vector<8x1xf32>
    %124 = vector.broadcast %123 : vector<8x1xf32> to vector<8x128xf32>
    %125 = arith.subf %119, %124 : vector<8x128xf32>
    %c5_69 = arith.constant 5 : index
    %c0_70 = arith.constant 0 : index
    %c0_71 = arith.constant 0 : index
    %126 = vector.load %arg5[%c5_69, %c0_70, %c0_71] : memref<12x8x128xf32, #tpu.memory_space<vmem>>, vector<1x8x128xf32>
    %127 = vector.shape_cast %126 : vector<1x8x128xf32> to vector<8x128xf32>
    %128 = vector.shape_cast %125 : vector<8x128xf32> to vector<1x8x128xf32>
    tpu.vector_store %arg5[%c5_69, %c0_70, %c0_71], %128 {strides = array<i32>} : memref<12x8x128xf32, #tpu.memory_space<vmem>>, vector<1x8x128xf32>,
    %c0_72 = arith.constant 0 : index
    %c0_73 = arith.constant 0 : index
    %129 = vector.load %arg7[%c0_72, %c0_73] : memref<8x128xf32, #tpu.memory_space<vmem>>, vector<8x128xf32>
    tpu.vector_store %arg7[%c0_72, %c0_73], %114 {strides = array<i32>} : memref<8x128xf32, #tpu.memory_space<vmem>>, vector<8x128xf32>,
    %c0_74 = arith.constant 0 : index
    %c0_75 = arith.constant 0 : index
    %130 = vector.load %arg7[%c0_74, %c0_75] : memref<8x128xf32, #tpu.memory_space<vmem>>, vector<8x128xf32>
    %cst_76 = arith.constant dense<0.000000e+00> : vector<8x256xf32>
    %131 = tpu.matmul %130, %3, %cst_76 {dimension_numbers = #tpu.dot_dimension_numbers<[1], [0], [0], [1], [0, 0, 1, 1], [], []>} : vector<8x128xf32>, vector<128x256xf32>, vector<8x256xf32> -> vector<8x256xf32>
    %c6 = arith.constant 6 : index
    %c0_77 = arith.constant 0 : index
    %c0_78 = arith.constant 0 : index
    %132 = vector.load %arg2[%c6, %c0_77, %c0_78] : memref<12x8x256xf32, #tpu.memory_space<vmem>>, vector<1x8x256xf32>
    %133 = vector.shape_cast %132 : vector<1x8x256xf32> to vector<8x256xf32>
    %134 = arith.addf %131, %133 : vector<8x256xf32>
    %135 = vector.extract_strided_slice %134 {offsets = [0, 0], sizes = [8, 128], strides = [1, 1]} : vector<8x256xf32> to vector<8x128xf32>
    %136 = vector.extract_strided_slice %134 {offsets = [0, 128], sizes = [8, 128], strides = [1, 1]} : vector<8x256xf32> to vector<8x128xf32>
    %cst_79 = arith.constant dense<0xFF800000> : vector<8xf32>
    %137 = vector.multi_reduction <maximumf>, %136, %cst_79 [1] : vector<8x128xf32> to vector<8xf32>
    %138 = vector.shape_cast %137 : vector<8xf32> to vector<8x1xf32>
    %139 = vector.broadcast %138 : vector<8x1xf32> to vector<8x128xf32>
    %140 = arith.subf %136, %139 : vector<8x128xf32>
    %141 = math.exp %140 : vector<8x128xf32>
    %cst_80 = arith.constant dense<0.000000e+00> : vector<8xf32>
    %142 = vector.multi_reduction <add>, %141, %cst_80 [1] : vector<8x128xf32> to vector<8xf32>
    %143 = vector.shape_cast %142 : vector<8xf32> to vector<8x1xf32>
    %144 = math.log %143 : vector<8x1xf32>
    %145 = vector.broadcast %144 : vector<8x1xf32> to vector<8x128xf32>
    %146 = arith.subf %140, %145 : vector<8x128xf32>
    %c6_81 = arith.constant 6 : index
    %c0_82 = arith.constant 0 : index
    %c0_83 = arith.constant 0 : index
    %147 = vector.load %arg5[%c6_81, %c0_82, %c0_83] : memref<12x8x128xf32, #tpu.memory_space<vmem>>, vector<1x8x128xf32>
    %148 = vector.shape_cast %147 : vector<1x8x128xf32> to vector<8x128xf32>
    %149 = vector.shape_cast %146 : vector<8x128xf32> to vector<1x8x128xf32>
    tpu.vector_store %arg5[%c6_81, %c0_82, %c0_83], %149 {strides = array<i32>} : memref<12x8x128xf32, #tpu.memory_space<vmem>>, vector<1x8x128xf32>,
    %c0_84 = arith.constant 0 : index
    %c0_85 = arith.constant 0 : index
    %150 = vector.load %arg7[%c0_84, %c0_85] : memref<8x128xf32, #tpu.memory_space<vmem>>, vector<8x128xf32>
    tpu.vector_store %arg7[%c0_84, %c0_85], %135 {strides = array<i32>} : memref<8x128xf32, #tpu.memory_space<vmem>>, vector<8x128xf32>,
    %c0_86 = arith.constant 0 : index
    %c0_87 = arith.constant 0 : index
    %151 = vector.load %arg7[%c0_86, %c0_87] : memref<8x128xf32, #tpu.memory_space<vmem>>, vector<8x128xf32>
    %cst_88 = arith.constant dense<0.000000e+00> : vector<8x256xf32>
    %152 = tpu.matmul %151, %3, %cst_88 {dimension_numbers = #tpu.dot_dimension_numbers<[1], [0], [0], [1], [0, 0, 1, 1], [], []>} : vector<8x128xf32>, vector<128x256xf32>, vector<8x256xf32> -> vector<8x256xf32>
    %c7 = arith.constant 7 : index
    %c0_89 = arith.constant 0 : index
    %c0_90 = arith.constant 0 : index
    %153 = vector.load %arg2[%c7, %c0_89, %c0_90] : memref<12x8x256xf32, #tpu.memory_space<vmem>>, vector<1x8x256xf32>
    %154 = vector.shape_cast %153 : vector<1x8x256xf32> to vector<8x256xf32>
    %155 = arith.addf %152, %154 : vector<8x256xf32>
    %156 = vector.extract_strided_slice %155 {offsets = [0, 0], sizes = [8, 128], strides = [1, 1]} : vector<8x256xf32> to vector<8x128xf32>
    %157 = vector.extract_strided_slice %155 {offsets = [0, 128], sizes = [8, 128], strides = [1, 1]} : vector<8x256xf32> to vector<8x128xf32>
    %cst_91 = arith.constant dense<0xFF800000> : vector<8xf32>
    %158 = vector.multi_reduction <maximumf>, %157, %cst_91 [1] : vector<8x128xf32> to vector<8xf32>
    %159 = vector.shape_cast %158 : vector<8xf32> to vector<8x1xf32>
    %160 = vector.broadcast %159 : vector<8x1xf32> to vector<8x128xf32>
    %161 = arith.subf %157, %160 : vector<8x128xf32>
    %162 = math.exp %161 : vector<8x128xf32>
    %cst_92 = arith.constant dense<0.000000e+00> : vector<8xf32>
    %163 = vector.multi_reduction <add>, %162, %cst_92 [1] : vector<8x128xf32> to vector<8xf32>
    %164 = vector.shape_cast %163 : vector<8xf32> to vector<8x1xf32>
    %165 = math.log %164 : vector<8x1xf32>
    %166 = vector.broadcast %165 : vector<8x1xf32> to vector<8x128xf32>
    %167 = arith.subf %161, %166 : vector<8x128xf32>
    %c7_93 = arith.constant 7 : index
    %c0_94 = arith.constant 0 : index
    %c0_95 = arith.constant 0 : index
    %168 = vector.load %arg5[%c7_93, %c0_94, %c0_95] : memref<12x8x128xf32, #tpu.memory_space<vmem>>, vector<1x8x128xf32>
    %169 = vector.shape_cast %168 : vector<1x8x128xf32> to vector<8x128xf32>
    %170 = vector.shape_cast %167 : vector<8x128xf32> to vector<1x8x128xf32>
    tpu.vector_store %arg5[%c7_93, %c0_94, %c0_95], %170 {strides = array<i32>} : memref<12x8x128xf32, #tpu.memory_space<vmem>>, vector<1x8x128xf32>,
    %c0_96 = arith.constant 0 : index
    %c0_97 = arith.constant 0 : index
    %171 = vector.load %arg7[%c0_96, %c0_97] : memref<8x128xf32, #tpu.memory_space<vmem>>, vector<8x128xf32>
    tpu.vector_store %arg7[%c0_96, %c0_97], %156 {strides = array<i32>} : memref<8x128xf32, #tpu.memory_space<vmem>>, vector<8x128xf32>,
    %c0_98 = arith.constant 0 : index
    %c0_99 = arith.constant 0 : index
    %172 = vector.load %arg7[%c0_98, %c0_99] : memref<8x128xf32, #tpu.memory_space<vmem>>, vector<8x128xf32>
    %cst_100 = arith.constant dense<0.000000e+00> : vector<8x256xf32>
    %173 = tpu.matmul %172, %3, %cst_100 {dimension_numbers = #tpu.dot_dimension_numbers<[1], [0], [0], [1], [0, 0, 1, 1], [], []>} : vector<8x128xf32>, vector<128x256xf32>, vector<8x256xf32> -> vector<8x256xf32>
    %c8 = arith.constant 8 : index
    %c0_101 = arith.constant 0 : index
    %c0_102 = arith.constant 0 : index
    %174 = vector.load %arg2[%c8, %c0_101, %c0_102] : memref<12x8x256xf32, #tpu.memory_space<vmem>>, vector<1x8x256xf32>
    %175 = vector.shape_cast %174 : vector<1x8x256xf32> to vector<8x256xf32>
    %176 = arith.addf %173, %175 : vector<8x256xf32>
    %177 = vector.extract_strided_slice %176 {offsets = [0, 0], sizes = [8, 128], strides = [1, 1]} : vector<8x256xf32> to vector<8x128xf32>
    %178 = vector.extract_strided_slice %176 {offsets = [0, 128], sizes = [8, 128], strides = [1, 1]} : vector<8x256xf32> to vector<8x128xf32>
    %cst_103 = arith.constant dense<0xFF800000> : vector<8xf32>
    %179 = vector.multi_reduction <maximumf>, %178, %cst_103 [1] : vector<8x128xf32> to vector<8xf32>
    %180 = vector.shape_cast %179 : vector<8xf32> to vector<8x1xf32>
    %181 = vector.broadcast %180 : vector<8x1xf32> to vector<8x128xf32>
    %182 = arith.subf %178, %181 : vector<8x128xf32>
    %183 = math.exp %182 : vector<8x128xf32>
    %cst_104 = arith.constant dense<0.000000e+00> : vector<8xf32>
    %184 = vector.multi_reduction <add>, %183, %cst_104 [1] : vector<8x128xf32> to vector<8xf32>
    %185 = vector.shape_cast %184 : vector<8xf32> to vector<8x1xf32>
    %186 = math.log %185 : vector<8x1xf32>
    %187 = vector.broadcast %186 : vector<8x1xf32> to vector<8x128xf32>
    %188 = arith.subf %182, %187 : vector<8x128xf32>
    %c8_105 = arith.constant 8 : index
    %c0_106 = arith.constant 0 : index
    %c0_107 = arith.constant 0 : index
    %189 = vector.load %arg5[%c8_105, %c0_106, %c0_107] : memref<12x8x128xf32, #tpu.memory_space<vmem>>, vector<1x8x128xf32>
    %190 = vector.shape_cast %189 : vector<1x8x128xf32> to vector<8x128xf32>
    %191 = vector.shape_cast %188 : vector<8x128xf32> to vector<1x8x128xf32>
    tpu.vector_store %arg5[%c8_105, %c0_106, %c0_107], %191 {strides = array<i32>} : memref<12x8x128xf32, #tpu.memory_space<vmem>>, vector<1x8x128xf32>,
    %c0_108 = arith.constant 0 : index
    %c0_109 = arith.constant 0 : index
    %192 = vector.load %arg7[%c0_108, %c0_109] : memref<8x128xf32, #tpu.memory_space<vmem>>, vector<8x128xf32>
    tpu.vector_store %arg7[%c0_108, %c0_109], %177 {strides = array<i32>} : memref<8x128xf32, #tpu.memory_space<vmem>>, vector<8x128xf32>,
    %c0_110 = arith.constant 0 : index
    %c0_111 = arith.constant 0 : index
    %193 = vector.load %arg7[%c0_110, %c0_111] : memref<8x128xf32, #tpu.memory_space<vmem>>, vector<8x128xf32>
    %cst_112 = arith.constant dense<0.000000e+00> : vector<8x256xf32>
    %194 = tpu.matmul %193, %3, %cst_112 {dimension_numbers = #tpu.dot_dimension_numbers<[1], [0], [0], [1], [0, 0, 1, 1], [], []>} : vector<8x128xf32>, vector<128x256xf32>, vector<8x256xf32> -> vector<8x256xf32>
    %c9 = arith.constant 9 : index
    %c0_113 = arith.constant 0 : index
    %c0_114 = arith.constant 0 : index
    %195 = vector.load %arg2[%c9, %c0_113, %c0_114] : memref<12x8x256xf32, #tpu.memory_space<vmem>>, vector<1x8x256xf32>
    %196 = vector.shape_cast %195 : vector<1x8x256xf32> to vector<8x256xf32>
    %197 = arith.addf %194, %196 : vector<8x256xf32>
    %198 = vector.extract_strided_slice %197 {offsets = [0, 0], sizes = [8, 128], strides = [1, 1]} : vector<8x256xf32> to vector<8x128xf32>
    %199 = vector.extract_strided_slice %197 {offsets = [0, 128], sizes = [8, 128], strides = [1, 1]} : vector<8x256xf32> to vector<8x128xf32>
    %cst_115 = arith.constant dense<0xFF800000> : vector<8xf32>
    %200 = vector.multi_reduction <maximumf>, %199, %cst_115 [1] : vector<8x128xf32> to vector<8xf32>
    %201 = vector.shape_cast %200 : vector<8xf32> to vector<8x1xf32>
    %202 = vector.broadcast %201 : vector<8x1xf32> to vector<8x128xf32>
    %203 = arith.subf %199, %202 : vector<8x128xf32>
    %204 = math.exp %203 : vector<8x128xf32>
    %cst_116 = arith.constant dense<0.000000e+00> : vector<8xf32>
    %205 = vector.multi_reduction <add>, %204, %cst_116 [1] : vector<8x128xf32> to vector<8xf32>
    %206 = vector.shape_cast %205 : vector<8xf32> to vector<8x1xf32>
    %207 = math.log %206 : vector<8x1xf32>
    %208 = vector.broadcast %207 : vector<8x1xf32> to vector<8x128xf32>
    %209 = arith.subf %203, %208 : vector<8x128xf32>
    %c9_117 = arith.constant 9 : index
    %c0_118 = arith.constant 0 : index
    %c0_119 = arith.constant 0 : index
    %210 = vector.load %arg5[%c9_117, %c0_118, %c0_119] : memref<12x8x128xf32, #tpu.memory_space<vmem>>, vector<1x8x128xf32>
    %211 = vector.shape_cast %210 : vector<1x8x128xf32> to vector<8x128xf32>
    %212 = vector.shape_cast %209 : vector<8x128xf32> to vector<1x8x128xf32>
    tpu.vector_store %arg5[%c9_117, %c0_118, %c0_119], %212 {strides = array<i32>} : memref<12x8x128xf32, #tpu.memory_space<vmem>>, vector<1x8x128xf32>,
    %c0_120 = arith.constant 0 : index
    %c0_121 = arith.constant 0 : index
    %213 = vector.load %arg7[%c0_120, %c0_121] : memref<8x128xf32, #tpu.memory_space<vmem>>, vector<8x128xf32>
    tpu.vector_store %arg7[%c0_120, %c0_121], %198 {strides = array<i32>} : memref<8x128xf32, #tpu.memory_space<vmem>>, vector<8x128xf32>,
    %c0_122 = arith.constant 0 : index
    %c0_123 = arith.constant 0 : index
    %214 = vector.load %arg7[%c0_122, %c0_123] : memref<8x128xf32, #tpu.memory_space<vmem>>, vector<8x128xf32>
    %cst_124 = arith.constant dense<0.000000e+00> : vector<8x256xf32>
    %215 = tpu.matmul %214, %3, %cst_124 {dimension_numbers = #tpu.dot_dimension_numbers<[1], [0], [0], [1], [0, 0, 1, 1], [], []>} : vector<8x128xf32>, vector<128x256xf32>, vector<8x256xf32> -> vector<8x256xf32>
    %c10 = arith.constant 10 : index
    %c0_125 = arith.constant 0 : index
    %c0_126 = arith.constant 0 : index
    %216 = vector.load %arg2[%c10, %c0_125, %c0_126] : memref<12x8x256xf32, #tpu.memory_space<vmem>>, vector<1x8x256xf32>
    %217 = vector.shape_cast %216 : vector<1x8x256xf32> to vector<8x256xf32>
    %218 = arith.addf %215, %217 : vector<8x256xf32>
    %219 = vector.extract_strided_slice %218 {offsets = [0, 0], sizes = [8, 128], strides = [1, 1]} : vector<8x256xf32> to vector<8x128xf32>
    %220 = vector.extract_strided_slice %218 {offsets = [0, 128], sizes = [8, 128], strides = [1, 1]} : vector<8x256xf32> to vector<8x128xf32>
    %cst_127 = arith.constant dense<0xFF800000> : vector<8xf32>
    %221 = vector.multi_reduction <maximumf>, %220, %cst_127 [1] : vector<8x128xf32> to vector<8xf32>
    %222 = vector.shape_cast %221 : vector<8xf32> to vector<8x1xf32>
    %223 = vector.broadcast %222 : vector<8x1xf32> to vector<8x128xf32>
    %224 = arith.subf %220, %223 : vector<8x128xf32>
    %225 = math.exp %224 : vector<8x128xf32>
    %cst_128 = arith.constant dense<0.000000e+00> : vector<8xf32>
    %226 = vector.multi_reduction <add>, %225, %cst_128 [1] : vector<8x128xf32> to vector<8xf32>
    %227 = vector.shape_cast %226 : vector<8xf32> to vector<8x1xf32>
    %228 = math.log %227 : vector<8x1xf32>
    %229 = vector.broadcast %228 : vector<8x1xf32> to vector<8x128xf32>
    %230 = arith.subf %224, %229 : vector<8x128xf32>
    %c10_129 = arith.constant 10 : index
    %c0_130 = arith.constant 0 : index
    %c0_131 = arith.constant 0 : index
    %231 = vector.load %arg5[%c10_129, %c0_130, %c0_131] : memref<12x8x128xf32, #tpu.memory_space<vmem>>, vector<1x8x128xf32>
    %232 = vector.shape_cast %231 : vector<1x8x128xf32> to vector<8x128xf32>
    %233 = vector.shape_cast %230 : vector<8x128xf32> to vector<1x8x128xf32>
    tpu.vector_store %arg5[%c10_129, %c0_130, %c0_131], %233 {strides = array<i32>} : memref<12x8x128xf32, #tpu.memory_space<vmem>>, vector<1x8x128xf32>,
    %c0_132 = arith.constant 0 : index
    %c0_133 = arith.constant 0 : index
    %234 = vector.load %arg7[%c0_132, %c0_133] : memref<8x128xf32, #tpu.memory_space<vmem>>, vector<8x128xf32>
    tpu.vector_store %arg7[%c0_132, %c0_133], %219 {strides = array<i32>} : memref<8x128xf32, #tpu.memory_space<vmem>>, vector<8x128xf32>,
    %c0_134 = arith.constant 0 : index
    %c0_135 = arith.constant 0 : index
    %235 = vector.load %arg7[%c0_134, %c0_135] : memref<8x128xf32, #tpu.memory_space<vmem>>, vector<8x128xf32>
    %cst_136 = arith.constant dense<0.000000e+00> : vector<8x256xf32>
    %236 = tpu.matmul %235, %3, %cst_136 {dimension_numbers = #tpu.dot_dimension_numbers<[1], [0], [0], [1], [0, 0, 1, 1], [], []>} : vector<8x128xf32>, vector<128x256xf32>, vector<8x256xf32> -> vector<8x256xf32>
    %c11 = arith.constant 11 : index
    %c0_137 = arith.constant 0 : index
    %c0_138 = arith.constant 0 : index
    %237 = vector.load %arg2[%c11, %c0_137, %c0_138] : memref<12x8x256xf32, #tpu.memory_space<vmem>>, vector<1x8x256xf32>
    %238 = vector.shape_cast %237 : vector<1x8x256xf32> to vector<8x256xf32>
    %239 = arith.addf %236, %238 : vector<8x256xf32>
    %240 = vector.extract_strided_slice %239 {offsets = [0, 0], sizes = [8, 128], strides = [1, 1]} : vector<8x256xf32> to vector<8x128xf32>
    %241 = vector.extract_strided_slice %239 {offsets = [0, 128], sizes = [8, 128], strides = [1, 1]} : vector<8x256xf32> to vector<8x128xf32>
    %cst_139 = arith.constant dense<0xFF800000> : vector<8xf32>
    %242 = vector.multi_reduction <maximumf>, %241, %cst_139 [1] : vector<8x128xf32> to vector<8xf32>
    %243 = vector.shape_cast %242 : vector<8xf32> to vector<8x1xf32>
    %244 = vector.broadcast %243 : vector<8x1xf32> to vector<8x128xf32>
    %245 = arith.subf %241, %244 : vector<8x128xf32>
    %246 = math.exp %245 : vector<8x128xf32>
    %cst_140 = arith.constant dense<0.000000e+00> : vector<8xf32>
    %247 = vector.multi_reduction <add>, %246, %cst_140 [1] : vector<8x128xf32> to vector<8xf32>
    %248 = vector.shape_cast %247 : vector<8xf32> to vector<8x1xf32>
    %249 = math.log %248 : vector<8x1xf32>
    %250 = vector.broadcast %249 : vector<8x1xf32> to vector<8x128xf32>
    %251 = arith.subf %245, %250 : vector<8x128xf32>
    %c11_141 = arith.constant 11 : index
    %c0_142 = arith.constant 0 : index
    %c0_143 = arith.constant 0 : index
    %252 = vector.load %arg5[%c11_141, %c0_142, %c0_143] : memref<12x8x128xf32, #tpu.memory_space<vmem>>, vector<1x8x128xf32>
    %253 = vector.shape_cast %252 : vector<1x8x128xf32> to vector<8x128xf32>
    %254 = vector.shape_cast %251 : vector<8x128xf32> to vector<1x8x128xf32>
    tpu.vector_store %arg5[%c11_141, %c0_142, %c0_143], %254 {strides = array<i32>} : memref<12x8x128xf32, #tpu.memory_space<vmem>>, vector<1x8x128xf32>,
    %c0_144 = arith.constant 0 : index
    %c0_145 = arith.constant 0 : index
    %255 = vector.load %arg7[%c0_144, %c0_145] : memref<8x128xf32, #tpu.memory_space<vmem>>, vector<8x128xf32>
    tpu.vector_store %arg7[%c0_144, %c0_145], %240 {strides = array<i32>} : memref<8x128xf32, #tpu.memory_space<vmem>>, vector<8x128xf32>,
    %c0_i32_146 = arith.constant 0 : i32
    %256 = arith.cmpi eq, %arg1, %c0_i32_146 : i32
    %257 = arith.extui %256 : i1 to i32
    %c0_i32_147 = arith.constant 0 : i32
    %258 = arith.cmpi ne, %257, %c0_i32_147 : i32
    scf.if %258 {
      %c0_148 = arith.constant 0 : index
      %c0_149 = arith.constant 0 : index
      %259 = vector.load %arg7[%c0_148, %c0_149] : memref<8x128xf32, #tpu.memory_space<vmem>>, vector<8x128xf32>
      %c0_150 = arith.constant 0 : index
      %c0_151 = arith.constant 0 : index
      %260 = vector.load %arg6[%c0_150, %c0_151] : memref<8x128xf32, #tpu.memory_space<vmem>>, vector<8x128xf32>
      tpu.vector_store %arg6[%c0_150, %c0_151], %259 {strides = array<i32>} : memref<8x128xf32, #tpu.memory_space<vmem>>, vector<8x128xf32>,
    } else {
    }
    return
  }
  func.func @transform_0(%arg0: i32, %arg1: i32) -> (i32, i32, i32) {
    %c0_i32 = arith.constant 0 : i32
    %c0_i32_0 = arith.constant 0 : i32
    return %arg1, %arg0, %c0_i32 : i32, i32, i32
  }
  func.func @transform_1(%arg0: i32, %arg1: i32) -> (i32, i32) {
    %c0_i32 = arith.constant 0 : i32
    %c0_i32_0 = arith.constant 0 : i32
    return %arg0, %c0_i32 : i32, i32
  }
  func.func @transform_2(%arg0: i32, %arg1: i32) -> (i32, i32) {
    %c0_i32 = arith.constant 0 : i32
    %c0_i32_0 = arith.constant 0 : i32
    %c0_i32_1 = arith.constant 0 : i32
    return %c0_i32, %c0_i32_0 : i32, i32
  }
  func.func @transform_3(%arg0: i32, %arg1: i32) -> (i32, i32, i32) {
    %c0_i32 = arith.constant 0 : i32
    %c0_i32_0 = arith.constant 0 : i32
    return %arg1, %arg0, %c0_i32 : i32, i32, i32
  }
  func.func @transform_4(%arg0: i32, %arg1: i32) -> (i32, i32) {
    %c0_i32 = arith.constant 0 : i32
    %c0_i32_0 = arith.constant 0 : i32
    return %arg0, %c0_i32 : i32, i32
  }
}

</mosaic_0001>

<bundles_post_ra>
// kernel: rnn_sequence_forward.1
= control target key start
LH: loop header
LB: loop body
LE: loop exit
PB: predicated region body
PF: predicated region fallthrough
CT: control target
= control target key end

     0   :  { %10 = vsyncpa [#allocation5], 0  ;;  %s2738_s0 = inlined_call_operand.vmem [shape: f32[12,16,256], index: 0, kind: input, shape index: {}]   ;;  %s2739_s1 = inlined_call_operand.vmem [shape: f32[16,128], index: 1, kind: input, shape index: {}]   ;;  %s2740_s2 = inlined_call_operand.vmem [shape: f32[128,256], index: 2, kind: input, shape index: {}]   ;;  %s2741_s3 = inlined_call_operand.hbm [shape: f32[12,16,128], index: 3, kind: output, shape index: {0}]   ;;  %s2742_s4 = inlined_call_operand.hbm [shape: f32[16,128], index: 4, kind: output, shape index: {1}]  }
   0x1   :  { %12 = vsyncpa [#allocation5 + $0x1], 0 }
   0x2   :  { %13 = vsyncpa [#allocation7], 0 }
   0x3   :  { %15 = vsyncpa [#allocation7 + $0x1], 0  ;;  %s1869_s15 = smov 0   ;;  %s1871_s16 = smov 0  }
   0x4   :  { %s1873_s17 = smov 0   ;;  %s1875_s18 = smov 0  }
   0x5   :  { %s1877_s19 = smov 0   ;;  %s1879_s20 = smov 0  }
   0x6 LB: > { %s1567_s21 = sadd.s32 4294967295, %s1836_s20   ;;  %s1568_s22 = sadd.s32 4294967294, %s1836_s20   ;;  %s1836_s20 = sphi %s1879_s20, %s21_s20   ;;  %s1832_s19 = sphi %s1877_s19, %s2751_s19   ;;  %s1828_s18 = sphi %s1875_s18, %s2750_s18   ;;  %s1824_s17 = sphi %s1873_s17, %s2749_s17   ;;  %s1820_s16 = sphi %s1871_s16, %s2748_s16   ;;  %s1816_s15 = sphi %s1869_s15, %s2747_s15  }
   0x7   : > { %s33_s23 = sadd.s32 1, %s1832_s19  ;;  %s42_s24 = sadd.s32 1, %s1824_s17 }
   0x8   : > { %p35_p0 = scmp.ge.s32.totalorder %s33_s23, 2  ;;  %p49_p1 = scmp.ne.s32.totalorder %s1824_s17, %s1820_s16 }
   0x9   : > { %p50_p2 = scmp.eq.s32.totalorder %s1836_s20, 0  ;;  %p128_p3 = scmp.eq.s32.totalorder %s1567_s21, 1 }
   0xa   : > { %s2753_s23 = smov (%p35_p0, %s33_s23), 0  ;;  %p133_p6 = scmp.ne.s32.totalorder %s1820_s16, %s1816_s15 }
   0xb   : > { %p51_p4 = por %p50_p2, %p49_p1  ;;  %p1908_p5 = por %p128_p3, %p49_p1 }
   0xc   : > { %s38_s26 = ssub.s32 %s1832_s19, %s2753_s23  ;;  %p134_p8 = scmp.eq.s32.totalorder %s1568_s22, 1 }
   0xd   : > { %p40_p7 = scmp.eq.s32.totalorder %s38_s26, 0  ;;  %p2743_p10 = scmp.ge.s32.totalorder %s1836_s20, 2 }
   0xe   : > { %p1919_p9 = por %p134_p8, %p133_p6 }
   0xf   : > { %s1917_s27 = scalar_select %p40_p7, %s1824_s17, %s42_s24  }
  0x10   : > { %179 = sbr.rel (%p2743_p10) target bundleno = 37 (0x25), region = 20 }
  0x15   : > { %182 = sbr.rel (!%p51_p4) target bundleno = 37 (0x25), region = 24  ;;  %s184_s29 = sand.u32 (%p51_p4), 1, %s1824_s17  }
  0x16   : > { %s1614_s30 = sshll.u32 (%p51_p4), %s1832_s19, 4  ;;  %s1615_s5 = smul.u32 (%p51_p4), 192, %s184_s29 }
  0x17   : > { %s1931_s8 = scalar_lea.vmem (%p51_p4), %s2738_s0, %s1614_s30 }
  0x18   : > { %v205_v0 = vld [vmem:[%s1931_s8] sm:$0xff] (%p51_p4)  ;;  %v207_v1 = vld [vmem:[%s1931_s8 + $0x8] sm:$0xff] (%p51_p4)  ;;  %s1939_s9 = scalar_lea.vmem (%p51_p4), [#allocation3], %s1615_s5 }
  0x19   : > { %v209_v2 = vld [vmem:[%s1931_s8 + $0x20] sm:$0xff] (%p51_p4)  ;;  %v211_v3 = vld [vmem:[%s1931_s8 + $0x28] sm:$0xff] (%p51_p4)  ;;  %206 = vst [vmem:[%s1939_s9] sm:$0xff] (%p51_p4), %v205_v0  ;;  %208 = vst [vmem:[%s1939_s9 + $0x8] sm:$0xff] (%p51_p4), %v207_v1 }
  0x1a   : > { %v213_v4 = vld [vmem:[%s1931_s8 + $0x40] sm:$0xff]  ;;  %v215_v5 = vld [vmem:[%s1931_s8 + $0x48] sm:$0xff]  ;;  %210 = vst [vmem:[%s1939_s9 + $0x10] sm:$0xff] %v209_v2  ;;  %212 = vst [vmem:[%s1939_s9 + $0x18] sm:$0xff] %v211_v3 }
  0x1b   : > { %214 = vst [vmem:[%s1939_s9 + $0x20] sm:$0xff] %v213_v4  ;;  %216 = vst [vmem:[%s1939_s9 + $0x28] sm:$0xff] %v215_v5  ;;  %v217_v6 = vld [vmem:[%s1931_s8 + $0x60] sm:$0xff]  ;;  %v219_v7 = vld [vmem:[%s1931_s8 + $0x68] sm:$0xff] }
  0x1c   : > { %v221_v8 = vld [vmem:[%s1931_s8 + $0x80] sm:$0xff]  ;;  %218 = vst [vmem:[%s1939_s9 + $0x30] sm:$0xff] %v217_v6  ;;  %220 = vst [vmem:[%s1939_s9 + $0x38] sm:$0xff] %v219_v7  ;;  %v223_v9 = vld [vmem:[%s1931_s8 + $0x88] sm:$0xff] }
  0x1d   : > { %222 = vst [vmem:[%s1939_s9 + $0x40] sm:$0xff] %v221_v8  ;;  %v225_v10 = vld [vmem:[%s1931_s8 + $0xa0] sm:$0xff]  ;;  %v227_v11 = vld [vmem:[%s1931_s8 + $0xa8] sm:$0xff]  ;;  %224 = vst [vmem:[%s1939_s9 + $0x48] sm:$0xff] %v223_v9 }
  0x1e   : > { %226 = vst [vmem:[%s1939_s9 + $0x50] sm:$0xff] %v225_v10  ;;  %228 = vst [vmem:[%s1939_s9 + $0x58] sm:$0xff] %v227_v11  ;;  %v229_v12 = vld [vmem:[%s1931_s8 + $0xc0] sm:$0xff]  ;;  %v231_v13 = vld [vmem:[%s1931_s8 + $0xc8] sm:$0xff] }
  0x1f   : > { %v233_v14 = vld [vmem:[%s1931_s8 + $0xe0] sm:$0xff]  ;;  %230 = vst [vmem:[%s1939_s9 + $0x60] sm:$0xff] %v229_v12  ;;  %232 = vst [vmem:[%s1939_s9 + $0x68] sm:$0xff] %v231_v13  ;;  %v235_v15 = vld [vmem:[%s1931_s8 + $0xe8] sm:$0xff] }
  0x20   : > { %234 = vst [vmem:[%s1939_s9 + $0x70] sm:$0xff] %v233_v14  ;;  %v237_v16 = vld [vmem:[%s1931_s8 + $0x100] sm:$0xff]  ;;  %v239_v17 = vld [vmem:[%s1931_s8 + $0x108] sm:$0xff]  ;;  %236 = vst [vmem:[%s1939_s9 + $0x78] sm:$0xff] %v235_v15 }
  0x21   : > { %238 = vst [vmem:[%s1939_s9 + $0x80] sm:$0xff] %v237_v16  ;;  %240 = vst [vmem:[%s1939_s9 + $0x88] sm:$0xff] %v239_v17  ;;  %v241_v18 = vld [vmem:[%s1931_s8 + $0x120] sm:$0xff]  ;;  %v243_v19 = vld [vmem:[%s1931_s8 + $0x128] sm:$0xff] }
  0x22   : > { %v245_v20 = vld [vmem:[%s1931_s8 + $0x140] sm:$0xff]  ;;  %242 = vst [vmem:[%s1939_s9 + $0x90] sm:$0xff] %v241_v18  ;;  %244 = vst [vmem:[%s1939_s9 + $0x98] sm:$0xff] %v243_v19  ;;  %v247_v21 = vld [vmem:[%s1931_s8 + $0x148] sm:$0xff] }
  0x23   : > { %246 = vst [vmem:[%s1939_s9 + $0xa0] sm:$0xff] %v245_v20  ;;  %v249_v22 = vld [vmem:[%s1931_s8 + $0x160] sm:$0xff]  ;;  %v251_v23 = vld [vmem:[%s1931_s8 + $0x168] sm:$0xff]  ;;  %248 = vst [vmem:[%s1939_s9 + $0xa8] sm:$0xff] %v247_v21 }
  0x24   : > { %250 = vst [vmem:[%s1939_s9 + $0xb0] sm:$0xff] %v249_v22  ;;  %252 = vst [vmem:[%s1939_s9 + $0xb8] sm:$0xff] %v251_v23 }
  0x25 PF: > { %p1573_p11 = scmp.ge.s32.totalorder %s1836_s20, 1  ;;  %p264_p12 = scmp.lt.s32.totalorder %s1836_s20, 3 }
  0x27   : > { %p265_p13 = pnand %p1573_p11, %p264_p12 }
  0x28   : > { %p306_p0 = scmp.lt.s32.totalorder (!%p265_p13), %s1828_s18, 1  ;;  %s2252_s21 = sand.u32 (!%p265_p13), 1, %s1820_s16  }
  0x29   : > { %268 = sbr.rel (%p265_p13) target bundleno = 2748 (0xabc), region = 51  ;;  %s1574_s30 = sshll.u32 (!%p265_p13), %s2252_s21, 3 }
  0x2a   : > { %s1616_s22 = smul.u32 (!%p265_p13), 192, %s2252_s21  ;;  %s2643_s5 = scalar_lea.vmem (!%p265_p13), [#allocation6], %s1574_s30 }
  0x2b   : > { %s1617_s26 = smul.u32 (!%p265_p13), 96, %s2252_s21  ;;  %s1610_s6 = sshll.u32 (!%p265_p13), %s1828_s18, 7 }
  0x2c   : > { %s1443_s9 = scalar_lea.hbm (!%p265_p13), %s2742_s4, %s1610_s6  ;;  %s1414_s11 = scalar_lea.sflag (!%p265_p13), [#allocation7], %s2252_s21 }
  0x2d   : > { %s2615_s29 = scalar_lea.vmem (!%p265_p13), [#allocation4], %s1617_s26  ;;  %s1839_s13 = smov (!%p265_p13), [#allocation6]  }
  0x2e   : > { %v1988_v24 = vld [vmem:[%s2740_s2 + $0xf8] sm:$0xff]  ;;  %v1993_v25 = vld [vmem:[%s2740_s2 + $0xf0] sm:$0xff]  ;;  %v1998_v26 = vld [vmem:[%s2740_s2 + $0xe8] sm:$0xff]  ;;  %v1838_v28 = vmov 0.0   ;;  %s307_s8 = scalar_select %p306_p0, %s1828_s18, 1 }
  0x2f   : > { %352 = vmatprep.subr.mxu0 %v1988_v24  ;;  %v2004_v27 = vld [vmem:[%s2740_s2 + $0xe0] sm:$0xff]  ;;  %416 = vmatprep.mubr.f32.mxu0 %v1838_v28  ;;  %v2011_v29 = vld [vmem:[%s2740_s2 + $0xd8] sm:$0xff]  ;;  %v2018_v30 = vld [vmem:[%s2740_s2 + $0xd0] sm:$0xff]  ;;  %s1734_s14 = sshll.u32 %s1839_s13, 4  ;;  %s1735_s14 = int_to_ptr.vmem [resolvable:$false] %s1734_s14 }
  0x30   : > { %353 = vmatpush1.msra.mxu0 %v1993_v25  ;;  %439 = vmatprep.subr.mxu1 %v1988_v24  ;;  %v2025_v31 = vld [vmem:[%s2740_s2 + $0xc8] sm:$0xff]  ;;  %v2032_v32 = vld [vmem:[%s2740_s2 + $0xc0] sm:$0xff]  ;;  %v2039_v33 = vld [vmem:[%s2740_s2 + $0xb8] sm:$0xff]  ;;  %s1575_s24 = sshll.u32 %s307_s8, 3 }
  0x31   : > { %354 = vmatprep.subr.mxu0 %v1998_v26  ;;  %440 = vmatpush1.msra.mxu1 %v1993_v25  ;;  %v2046_v34 = vld [vmem:[%s2740_s2 + $0xb0] sm:$0xff]  ;;  %v2053_v35 = vld [vmem:[%s2740_s2 + $0xa8] sm:$0xff]  ;;  %v2060_v36 = vld [vmem:[%s2740_s2 + $0xa0] sm:$0xff]  ;;  %s309_s10 = scalar_lea.vmem %s2739_s1, %s1575_s24  ;;  %s2255_s24 = scalar_lea.vmem [#allocation3], %s1616_s22 }
  0x32   : > { %355 = vmatpush1.msra.mxu0 %v2004_v27  ;;  %441 = vmatprep.subr.mxu1 %v1998_v26  ;;  %v2067_v37 = vld [vmem:[%s2740_s2 + $0x98] sm:$0xff]  ;;  %v2074_v38 = vld [vmem:[%s2740_s2 + $0x90] sm:$0xff]  ;;  %v2081_v39 = vld [vmem:[%s2740_s2 + $0x88] sm:$0xff]  ;;  %s1736_s22 = scalar_lea.vmem %s1735_s14, 256 }
  0x33   : > { %356 = vmatprep.subr.mxu0 %v2011_v29  ;;  %442 = vmatpush1.msra.mxu1 %v2004_v27  ;;  %v2088_v40 = vld [vmem:[%s2740_s2 + $0x80] sm:$0xff]  ;;  %v2095_v41 = vld [vmem:[%s2740_s2 + $0x78] sm:$0xff]  ;;  %v2102_v42 = vld [vmem:[%s2740_s2 + $0x70] sm:$0xff] }
  0x34   : > { %357 = vmatpush1.msra.mxu0 %v2018_v30  ;;  %443 = vmatprep.subr.mxu1 %v2011_v29  ;;  %v2109_v43 = vld [vmem:[%s2740_s2 + $0x68] sm:$0xff]  ;;  %v2117_v44 = vld [vmem:[%s2740_s2 + $0x60] sm:$0xff]  ;;  %v2124_v45 = vld [vmem:[%s2740_s2 + $0x58] sm:$0xff] }
  0x35   : > { %358 = vmatprep.subr.mxu0 %v2025_v31  ;;  %444 = vmatpush1.msra.mxu1 %v2018_v30  ;;  %v2131_v46 = vld [vmem:[%s2740_s2 + $0x50] sm:$0xff]  ;;  %v2138_v47 = vld [vmem:[%s2740_s2 + $0x48] sm:$0xff]  ;;  %v2146_v48 = vld [vmem:[%s2740_s2 + $0x40] sm:$0xff] }
  0x36   : > { %359 = vmatpush1.msra.mxu0 %v2032_v32  ;;  %445 = vmatprep.subr.mxu1 %v2025_v31  ;;  %v2153_v49 = vld [vmem:[%s2740_s2 + $0x38] sm:$0xff]  ;;  %v2160_v50 = vld [vmem:[%s2740_s2 + $0x30] sm:$0xff]  ;;  %v2167_v51 = vld [vmem:[%s2740_s2 + $0x28] sm:$0xff] }
  0x37   : > { %360 = vmatprep.subr.mxu0 %v2039_v33  ;;  %446 = vmatpush1.msra.mxu1 %v2032_v32  ;;  %v2174_v52 = vld [vmem:[%s2740_s2 + $0x20] sm:$0xff]  ;;  %v2181_v53 = vld [vmem:[%s2740_s2 + $0x18] sm:$0xff]  ;;  %v2188_v54 = vld [vmem:[%s2740_s2 + $0x10] sm:$0xff] }
  0x38   : > { %361 = vmatpush1.msra.mxu0 %v2046_v34  ;;  %447 = vmatprep.subr.mxu1 %v2039_v33  ;;  %v2198_v55 = vld [vmem:[%s2740_s2 + $0x8] sm:$0xff]  ;;  %v2205_v56 = vld [vmem:[%s2740_s2] sm:$0xff]  ;;  %v1576_v0 = vld [vmem:[%s2255_s24 + $0x10] sm:$0xff] }
  0x39   : > { %362 = vmatprep.subr.mxu0 %v2053_v35  ;;  %448 = vmatpush1.msra.mxu1 %v2046_v34  ;;  %v315_v57 = vld [vmem:[%s309_s10] sm:$0xff]  ;;  %v351_v60 = vld [vmem:[%s2255_s24 + $0x8] sm:$0xff]  ;;  %v1577_v2 = vld [vmem:[%s2255_s24 + $0x18] sm:$0xff]  ;;  %s1445_s10 = sshll.u32 %s2643_s5, 4  ;;  %s1446_s10 = int_to_ptr.vmem [resolvable:$true] %s1445_s10 }
  0x3a   : > { %363 = vmatpush1.msra.mxu0 %v2060_v36  ;;  %449 = vmatprep.subr.mxu1 %v2053_v35  ;;  %v350_v58 = vld [vmem:[%s2255_s24] sm:$0xff]  ;;  %v1580_v8 = vld [vmem:[%s2255_s24 + $0x28] sm:$0xff]  ;;  %v1582_v12 = vld [vmem:[%s2255_s24 + $0x30] sm:$0xff]  ;;  %s1730_s12 = scalar_lea.vmem %s1446_s10, 128  ;;  %p1737_p4 = scmp.lt.s32.totalorder %s1446_s10, %s1735_s14 }
  0x3b   : > { %364 = vmatprep.subr.mxu0 %v2067_v37  ;;  %450 = vmatpush1.msra.mxu1 %v2060_v36  ;;  %v1579_v6 = vld [vmem:[%s2255_s24 + $0x20] sm:$0xff]  ;;  %v1583_v14 = vld [vmem:[%s2255_s24 + $0x38] sm:$0xff]  ;;  %v1586_v20 = vld [vmem:[%s2255_s24 + $0x48] sm:$0xff]  ;;  %p1731_p1 = scmp.ne.s32.totalorder %s1446_s10, %s1730_s12  ;;  %p1738_p6 = scmp.lt.s32.totalorder %s1736_s22, %s1730_s12 }
  0x3c   : > { %365 = vmatpush1.msra.mxu0 %v2074_v38  ;;  %451 = vmatprep.subr.mxu1 %v2067_v37  ;;  %v1585_v18 = vld [vmem:[%s2255_s24 + $0x40] sm:$0xff] }
  0x3d   : > { %366 = vmatprep.subr.mxu0 %v2081_v39  ;;  %452 = vmatpush1.msra.mxu1 %v2074_v38  ;;  %p1732_p2 = pnand %p1731_p1, %p1908_p5  ;;  %p1739_p7 = por %p1738_p6, %p1737_p4 }
  0x3e   : > { %367 = vmatpush1.msra.mxu0 %v2088_v40  ;;  %453 = vmatprep.subr.mxu1 %v2081_v39 }
  0x3f   : > { %368 = vmatprep.subr.mxu0 %v2095_v41  ;;  %454 = vmatpush1.msra.mxu1 %v2088_v40  ;;  %p1733_p3 = pneg %p1732_p2 }
  0x40   : > { %369 = vmatpush1.msra.mxu0 %v2102_v42  ;;  %455 = vmatprep.subr.mxu1 %v2095_v41 }
  0x41   : > { %370 = vmatprep.subr.mxu0 %v2109_v43  ;;  %456 = vmatpush1.msra.mxu1 %v2102_v42  ;;  %p1740_p8 = pnand %p1739_p7, %p1733_p3 }
  0x42   : > { %371 = vmatpush1.msra.mxu0 %v2117_v44  ;;  %457 = vmatprep.subr.mxu1 %v2109_v43 }
  0x43   : > { %372 = vmatprep.subr.mxu0 %v2124_v45  ;;  %458 = vmatpush1.msra.mxu1 %v2117_v44 }
  0x44   : > { %373 = vmatpush1.msra.mxu0 %v2131_v46  ;;  %459 = vmatprep.subr.mxu1 %v2124_v45 }
  0x45   : > { %374 = vmatprep.subr.mxu0 %v2138_v47  ;;  %460 = vmatpush1.msra.mxu1 %v2131_v46 }
  0x46   : > { %375 = vmatpush1.msra.mxu0 %v2146_v48  ;;  %461 = vmatprep.subr.mxu1 %v2138_v47 }
  0x47   : > { %376 = vmatprep.subr.mxu0 %v2153_v49  ;;  %462 = vmatpush1.msra.mxu1 %v2146_v48 }
  0x48   : > { %377 = vmatpush1.msra.mxu0 %v2160_v50  ;;  %463 = vmatprep.subr.mxu1 %v2153_v49 }
  0x49   : > { %378 = vmatprep.subr.mxu0 %v2167_v51  ;;  %464 = vmatpush1.msra.mxu1 %v2160_v50 }
  0x4a   : > { %379 = vmatpush1.msra.mxu0 %v2174_v52  ;;  %465 = vmatprep.subr.mxu1 %v2167_v51 }
  0x4b   : > { %380 = vmatprep.subr.mxu0 %v2181_v53  ;;  %466 = vmatpush1.msra.mxu1 %v2174_v52 }
  0x4c   : > { %381 = vmatpush1.msra.mxu0 %v2188_v54  ;;  %467 = vmatprep.subr.mxu1 %v2181_v53 }
  0x4d   : > { %382 = vmatprep.subr.mxu0 %v2198_v55  ;;  %468 = vmatpush1.msra.mxu1 %v2188_v54 }
  0x4e   : > { %383 = vmatpush1.msra.mxu0 %v2205_v56  ;;  %469 = vmatprep.subr.mxu1 %v2198_v55 }
  0x4f   : > { %417 = vmatmul.mubr.f32.vlgmr.msra.gmra.mxu0 %v315_v57  ;;  %470 = vmatpush1.msra.mxu1 %v2205_v56  ;;  %v1588_v57 = vld [vmem:[%s2255_s24 + $0x50] sm:$0xff] }
  0x50   : > { %503 = vmatprep.mubr.f32.mxu1 %v1838_v28  ;;  %527 = vmatprep.subr.mxu0 %v1988_v24 }
  0x51   : > { %528 = vmatpush1.msra.mxu0 %v1993_v25  ;;  %591 = vmatprep.mubr.f32.mxu0 %v1838_v28 }
  0x52   : > { %529 = vmatprep.subr.mxu0 %v1998_v26  ;;  %615 = vmatprep.subr.mxu1 %v1988_v24 }
  0x53   : > { %530 = vmatpush1.msra.mxu0 %v2004_v27 }
  0x54   : > { %531 = vmatprep.subr.mxu0 %v2011_v29 }
  0x55   : > { %532 = vmatpush1.msra.mxu0 %v2018_v30 }
  0x56   : > { %533 = vmatprep.subr.mxu0 %v2025_v31 }
  0x57   : > { %534 = vmatpush1.msra.mxu0 %v2032_v32 }
  0x58   : > { %535 = vmatprep.subr.mxu0 %v2039_v33 }
  0x59   : > { %536 = vmatpush1.msra.mxu0 %v2046_v34 }
  0x5a   : > { %537 = vmatprep.subr.mxu0 %v2053_v35 }
  0x5b   : > { %538 = vmatpush1.msra.mxu0 %v2060_v36 }
  0x5c   : > { %539 = vmatprep.subr.mxu0 %v2067_v37 }
  0x5d   : > { %540 = vmatpush1.msra.mxu0 %v2074_v38 }
  0x5e   : > { %541 = vmatprep.subr.mxu0 %v2081_v39 }
  0x5f   : > { %542 = vmatpush1.msra.mxu0 %v2088_v40 }
  0x60   : > { %543 = vmatprep.subr.mxu0 %v2095_v41 }
  0x61   : > { %544 = vmatpush1.msra.mxu0 %v2102_v42 }
  0x62   : > { %545 = vmatprep.subr.mxu0 %v2109_v43 }
  0x63   : > { %546 = vmatpush1.msra.mxu0 %v2117_v44 }
  0x64   : > { %547 = vmatprep.subr.mxu0 %v2124_v45 }
  0x65   : > { %548 = vmatpush1.msra.mxu0 %v2131_v46 }
  0x66   : > { %549 = vmatprep.subr.mxu0 %v2138_v47 }
  0x67   : > { %550 = vmatpush1.msra.mxu0 %v2146_v48 }
  0x68   : > { %551 = vmatprep.subr.mxu0 %v2153_v49 }
  0x69   : > { %552 = vmatpush1.msra.mxu0 %v2160_v50 }
  0x6a   : > { %553 = vmatprep.subr.mxu0 %v2167_v51 }
  0x6b   : > { %554 = vmatpush1.msra.mxu0 %v2174_v52 }
  0x6c   : > { %555 = vmatprep.subr.mxu0 %v2181_v53 }
  0x6d   : > { %556 = vmatpush1.msra.mxu0 %v2188_v54 }
  0x6e   : > { %557 = vmatprep.subr.mxu0 %v2198_v55 }
  0x6f   : > { %558 = vmatpush1.msra.mxu0 %v2205_v56 }
  0x70   : > { %703 = vmatprep.subr.mxu0 %v1988_v24 }
 0x10f   : > { %v418_v59 = vpop.f32.mrf.mxu0 }
 0x110   : > { %v419_v61 = vadd.f32 %v418_v59, %v350_v58  ;;  %v1589_v59 = vld [vmem:[%s2255_s24 + $0x58] sm:$0xff] }
 0x111   : > { %v420_v62 = vpop.f32.mrf.mxu0 }
 0x112   : > { %v2259_v63 = vadd.f32 %v420_v62, %v351_v60  ;;  %504 = vmatmul.mubr.f32.vlgmr.msra.gmra.mxu1 %v419_v61 }
 0x113   : > { %616 = vmatpush1.msra.mxu1 %v1993_v25  ;;  %679 = vmatprep.mubr.f32.mxu1 %v1838_v28 }
 0x114   : > { %423 = vmax.xlane.f32.xlu0 %v2259_v63  ;;  %617 = vmatprep.subr.mxu1 %v1998_v26 }
 0x115   : > { %618 = vmatpush1.msra.mxu1 %v2004_v27 }
 0x116   : > { %619 = vmatprep.subr.mxu1 %v2011_v29 }
 0x117   : > { %620 = vmatpush1.msra.mxu1 %v2018_v30 }
 0x118   : > { %621 = vmatprep.subr.mxu1 %v2025_v31 }
 0x119   : > { %622 = vmatpush1.msra.mxu1 %v2032_v32 }
 0x11a   : > { %623 = vmatprep.subr.mxu1 %v2039_v33 }
 0x11b   : > { %624 = vmatpush1.msra.mxu1 %v2046_v34 }
 0x11c   : > { %625 = vmatprep.subr.mxu1 %v2053_v35 }
 0x11d   : > { %626 = vmatpush1.msra.mxu1 %v2060_v36 }
 0x11e   : > { %627 = vmatprep.subr.mxu1 %v2067_v37 }
 0x11f   : > { %628 = vmatpush1.msra.mxu1 %v2074_v38 }
 0x120   : > { %629 = vmatprep.subr.mxu1 %v2081_v39 }
 0x121   : > { %630 = vmatpush1.msra.mxu1 %v2088_v40 }
 0x122   : > { %631 = vmatprep.subr.mxu1 %v2095_v41 }
 0x123   : > { %632 = vmatpush1.msra.mxu1 %v2102_v42 }
 0x124   : > { %633 = vmatprep.subr.mxu1 %v2109_v43 }
 0x125   : > { %634 = vmatpush1.msra.mxu1 %v2117_v44 }
 0x126   : > { %635 = vmatprep.subr.mxu1 %v2124_v45 }
 0x127   : > { %636 = vmatpush1.msra.mxu1 %v2131_v46 }
 0x128   : > { %637 = vmatprep.subr.mxu1 %v2138_v47 }
 0x129   : > { %638 = vmatpush1.msra.mxu1 %v2146_v48 }
 0x12a   : > { %639 = vmatprep.subr.mxu1 %v2153_v49 }
 0x12b   : > { %640 = vmatpush1.msra.mxu1 %v2160_v50 }
 0x12c   : > { %641 = vmatprep.subr.mxu1 %v2167_v51 }
 0x12d   : > { %642 = vmatpush1.msra.mxu1 %v2174_v52 }
 0x12e   : > { %643 = vmatprep.subr.mxu1 %v2181_v53 }
 0x12f   : > { %644 = vmatpush1.msra.mxu1 %v2188_v54 }
 0x130   : > { %645 = vmatprep.subr.mxu1 %v2198_v55 }
 0x131   : > { %646 = vmatpush1.msra.mxu1 %v2205_v56 }
 0x132   : > { %791 = vmatprep.subr.mxu1 %v1988_v24 }
 0x1d2   : > { %v505_v1 = vpop.f32.mrf.mxu1 }
 0x1d3   : > { %v506_v3 = vadd.f32 %v1576_v0, %v505_v1  ;;  %v1591_v0 = vld [vmem:[%s2255_s24 + $0x60] sm:$0xff] }
 0x1d4   : > { %v507_v4 = vpop.f32.mrf.mxu1 }
 0x1d5   : > { %v2297_v5 = vadd.f32 %v1577_v2, %v507_v4  ;;  %592 = vmatmul.mubr.f32.vlgmr.msra.gmra.mxu0 %v506_v3  ;;  %v1592_v2 = vld [vmem:[%s2255_s24 + $0x68] sm:$0xff] }
 0x1d6   : > { %704 = vmatpush1.msra.mxu0 %v1993_v25  ;;  %767 = vmatprep.mubr.f32.mxu0 %v1838_v28 }
 0x1d7   : > { %510 = vmax.xlane.f32.xlu0 %v2297_v5  ;;  %705 = vmatprep.subr.mxu0 %v1998_v26 }
 0x1d8   : > { %706 = vmatpush1.msra.mxu0 %v2004_v27 }
 0x1d9   : > { %707 = vmatprep.subr.mxu0 %v2011_v29 }
 0x1da   : > { %708 = vmatpush1.msra.mxu0 %v2018_v30 }
 0x1db   : > { %709 = vmatprep.subr.mxu0 %v2025_v31 }
 0x1dc   : > { %710 = vmatpush1.msra.mxu0 %v2032_v32 }
 0x1dd   : > { %711 = vmatprep.subr.mxu0 %v2039_v33 }
 0x1de   : > { %712 = vmatpush1.msra.mxu0 %v2046_v34 }
 0x1df   : > { %713 = vmatprep.subr.mxu0 %v2053_v35 }
 0x1e0   : > { %714 = vmatpush1.msra.mxu0 %v2060_v36 }
 0x1e1   : > { %715 = vmatprep.subr.mxu0 %v2067_v37 }
 0x1e2   : > { %716 = vmatpush1.msra.mxu0 %v2074_v38 }
 0x1e3   : > { %717 = vmatprep.subr.mxu0 %v2081_v39 }
 0x1e4   : > { %718 = vmatpush1.msra.mxu0 %v2088_v40 }
 0x1e5   : > { %719 = vmatprep.subr.mxu0 %v2095_v41 }
 0x1e6   : > { %720 = vmatpush1.msra.mxu0 %v2102_v42 }
 0x1e7   : > { %721 = vmatprep.subr.mxu0 %v2109_v43 }
 0x1e8   : > { %722 = vmatpush1.msra.mxu0 %v2117_v44 }
 0x1e9   : > { %723 = vmatprep.subr.mxu0 %v2124_v45 }
 0x1ea   : > { %724 = vmatpush1.msra.mxu0 %v2131_v46 }
 0x1eb   : > { %725 = vmatprep.subr.mxu0 %v2138_v47 }
 0x1ec   : > { %726 = vmatpush1.msra.mxu0 %v2146_v48 }
 0x1ed   : > { %727 = vmatprep.subr.mxu0 %v2153_v49 }
 0x1ee   : > { %728 = vmatpush1.msra.mxu0 %v2160_v50 }
 0x1ef   : > { %729 = vmatprep.subr.mxu0 %v2167_v51 }
 0x1f0   : > { %730 = vmatpush1.msra.mxu0 %v2174_v52 }
 0x1f1   : > { %731 = vmatprep.subr.mxu0 %v2181_v53 }
 0x1f2   : > { %732 = vmatpush1.msra.mxu0 %v2188_v54 }
 0x1f3   : > { %733 = vmatprep.subr.mxu0 %v2198_v55 }
 0x1f4   : > { %734 = vmatpush1.msra.mxu0 %v2205_v56 }
 0x1f5   : > { %879 = vmatprep.subr.mxu0 %v1988_v24 }
 0x295   : > { %v593_v7 = vpop.f32.mrf.mxu0 }
 0x296   : > { %v594_v9 = vadd.f32 %v1579_v6, %v593_v7  ;;  %v1594_v7 = vld [vmem:[%s2255_s24 + $0x70] sm:$0xff] }
 0x297   : > { %v595_v10 = vpop.f32.mrf.mxu0 }
 0x298   : > { %v2335_v11 = vadd.f32 %v1580_v8, %v595_v10  ;;  %680 = vmatmul.mubr.f32.vlgmr.msra.gmra.mxu1 %v594_v9  ;;  %v1595_v9 = vld [vmem:[%s2255_s24 + $0x78] sm:$0xff] }
 0x299   : > { %792 = vmatpush1.msra.mxu1 %v1993_v25  ;;  %855 = vmatprep.mubr.f32.mxu1 %v1838_v28 }
 0x29a   : > { %598 = vmax.xlane.f32.xlu1 %v2335_v11  ;;  %793 = vmatprep.subr.mxu1 %v1998_v26 }
 0x29b   : > { %794 = vmatpush1.msra.mxu1 %v2004_v27 }
 0x29c   : > { %795 = vmatprep.subr.mxu1 %v2011_v29 }
 0x29d   : > { %796 = vmatpush1.msra.mxu1 %v2018_v30 }
 0x29e   : > { %797 = vmatprep.subr.mxu1 %v2025_v31 }
 0x29f   : > { %798 = vmatpush1.msra.mxu1 %v2032_v32 }
 0x2a0   : > { %799 = vmatprep.subr.mxu1 %v2039_v33 }
 0x2a1   : > { %800 = vmatpush1.msra.mxu1 %v2046_v34 }
 0x2a2   : > { %801 = vmatprep.subr.mxu1 %v2053_v35 }
 0x2a3   : > { %802 = vmatpush1.msra.mxu1 %v2060_v36 }
 0x2a4   : > { %803 = vmatprep.subr.mxu1 %v2067_v37 }
 0x2a5   : > { %804 = vmatpush1.msra.mxu1 %v2074_v38 }
 0x2a6   : > { %805 = vmatprep.subr.mxu1 %v2081_v39 }
 0x2a7   : > { %806 = vmatpush1.msra.mxu1 %v2088_v40 }
 0x2a8   : > { %807 = vmatprep.subr.mxu1 %v2095_v41 }
 0x2a9   : > { %808 = vmatpush1.msra.mxu1 %v2102_v42 }
 0x2aa   : > { %809 = vmatprep.subr.mxu1 %v2109_v43 }
 0x2ab   : > { %810 = vmatpush1.msra.mxu1 %v2117_v44 }
 0x2ac   : > { %811 = vmatprep.subr.mxu1 %v2124_v45 }
 0x2ad   : > { %812 = vmatpush1.msra.mxu1 %v2131_v46 }
 0x2ae   : > { %813 = vmatprep.subr.mxu1 %v2138_v47 }
 0x2af   : > { %814 = vmatpush1.msra.mxu1 %v2146_v48 }
 0x2b0   : > { %815 = vmatprep.subr.mxu1 %v2153_v49 }
 0x2b1   : > { %816 = vmatpush1.msra.mxu1 %v2160_v50 }
 0x2b2   : > { %817 = vmatprep.subr.mxu1 %v2167_v51 }
 0x2b3   : > { %818 = vmatpush1.msra.mxu1 %v2174_v52 }
 0x2b4   : > { %819 = vmatprep.subr.mxu1 %v2181_v53 }
 0x2b5   : > { %820 = vmatpush1.msra.mxu1 %v2188_v54 }
 0x2b6   : > { %821 = vmatprep.subr.mxu1 %v2198_v55 }
 0x2b7   : > { %822 = vmatpush1.msra.mxu1 %v2205_v56 }
 0x2b8   : > { %967 = vmatprep.subr.mxu1 %v1988_v24 }
 0x358   : > { %v681_v13 = vpop.f32.mrf.mxu1 }
 0x359   : > { %v682_v15 = vadd.f32 %v1582_v12, %v681_v13 }
 0x35a   : > { %v683_v16 = vpop.f32.mrf.mxu1 }
 0x35b   : > { %v2373_v17 = vadd.f32 %v1583_v14, %v683_v16  ;;  %768 = vmatmul.mubr.f32.vlgmr.msra.gmra.mxu0 %v682_v15  ;;  %v1598_v15 = vld [vmem:[%s2255_s24 + $0x88] sm:$0xff] }
 0x35c   : > { %880 = vmatpush1.msra.mxu0 %v1993_v25  ;;  %943 = vmatprep.mubr.f32.mxu0 %v1838_v28 }
 0x35d   : > { %686 = vmax.xlane.f32.xlu1 %v2373_v17  ;;  %881 = vmatprep.subr.mxu0 %v1998_v26 }
 0x35e   : > { %882 = vmatpush1.msra.mxu0 %v2004_v27 }
 0x35f   : > { %883 = vmatprep.subr.mxu0 %v2011_v29 }
 0x360   : > { %884 = vmatpush1.msra.mxu0 %v2018_v30 }
 0x361   : > { %885 = vmatprep.subr.mxu0 %v2025_v31 }
 0x362   : > { %886 = vmatpush1.msra.mxu0 %v2032_v32 }
 0x363   : > { %887 = vmatprep.subr.mxu0 %v2039_v33 }
 0x364   : > { %888 = vmatpush1.msra.mxu0 %v2046_v34 }
 0x365   : > { %889 = vmatprep.subr.mxu0 %v2053_v35 }
 0x366   : > { %890 = vmatpush1.msra.mxu0 %v2060_v36 }
 0x367   : > { %891 = vmatprep.subr.mxu0 %v2067_v37 }
 0x368   : > { %892 = vmatpush1.msra.mxu0 %v2074_v38 }
 0x369   : > { %893 = vmatprep.subr.mxu0 %v2081_v39 }
 0x36a   : > { %894 = vmatpush1.msra.mxu0 %v2088_v40 }
 0x36b   : > { %895 = vmatprep.subr.mxu0 %v2095_v41 }
 0x36c   : > { %896 = vmatpush1.msra.mxu0 %v2102_v42 }
 0x36d   : > { %897 = vmatprep.subr.mxu0 %v2109_v43 }
 0x36e   : > { %898 = vmatpush1.msra.mxu0 %v2117_v44 }
 0x36f   : > { %899 = vmatprep.subr.mxu0 %v2124_v45 }
 0x370   : > { %900 = vmatpush1.msra.mxu0 %v2131_v46 }
 0x371   : > { %901 = vmatprep.subr.mxu0 %v2138_v47 }
 0x372   : > { %902 = vmatpush1.msra.mxu0 %v2146_v48 }
 0x373   : > { %903 = vmatprep.subr.mxu0 %v2153_v49 }
 0x374   : > { %904 = vmatpush1.msra.mxu0 %v2160_v50 }
 0x375   : > { %905 = vmatprep.subr.mxu0 %v2167_v51 }
 0x376   : > { %906 = vmatpush1.msra.mxu0 %v2174_v52 }
 0x377   : > { %907 = vmatprep.subr.mxu0 %v2181_v53 }
 0x378   : > { %908 = vmatpush1.msra.mxu0 %v2188_v54 }
 0x379   : > { %909 = vmatprep.subr.mxu0 %v2198_v55 }
 0x37a   : > { %910 = vmatpush1.msra.mxu0 %v2205_v56 }
 0x37b   : > { %1055 = vmatprep.subr.mxu0 %v1988_v24 }
 0x41b   : > { %v769_v19 = vpop.f32.mrf.mxu0 }
 0x41c   : > { %v770_v21 = vadd.f32 %v1585_v18, %v769_v19 }
 0x41d   : > { %v771_v22 = vpop.f32.mrf.mxu0 }
 0x41e   : > { %v2411_v23 = vadd.f32 %v1586_v20, %v771_v22  ;;  %856 = vmatmul.mubr.f32.vlgmr.msra.gmra.mxu1 %v770_v21 }
 0x41f   : > { %968 = vmatpush1.msra.mxu1 %v1993_v25  ;;  %1031 = vmatprep.mubr.f32.mxu1 %v1838_v28 }
 0x420   : > { %774 = vmax.xlane.f32.xlu0 %v2411_v23  ;;  %969 = vmatprep.subr.mxu1 %v1998_v26 }
 0x421   : > { %970 = vmatpush1.msra.mxu1 %v2004_v27 }
 0x422   : > { %971 = vmatprep.subr.mxu1 %v2011_v29 }
 0x423   : > { %972 = vmatpush1.msra.mxu1 %v2018_v30 }
 0x424   : > { %973 = vmatprep.subr.mxu1 %v2025_v31 }
 0x425   : > { %974 = vmatpush1.msra.mxu1 %v2032_v32 }
 0x426   : > { %975 = vmatprep.subr.mxu1 %v2039_v33 }
 0x427   : > { %976 = vmatpush1.msra.mxu1 %v2046_v34 }
 0x428   : > { %977 = vmatprep.subr.mxu1 %v2053_v35 }
 0x429   : > { %978 = vmatpush1.msra.mxu1 %v2060_v36 }
 0x42a   : > { %979 = vmatprep.subr.mxu1 %v2067_v37 }
 0x42b   : > { %980 = vmatpush1.msra.mxu1 %v2074_v38 }
 0x42c   : > { %981 = vmatprep.subr.mxu1 %v2081_v39 }
 0x42d   : > { %982 = vmatpush1.msra.mxu1 %v2088_v40 }
 0x42e   : > { %983 = vmatprep.subr.mxu1 %v2095_v41 }
 0x42f   : > { %984 = vmatpush1.msra.mxu1 %v2102_v42 }
 0x430   : > { %985 = vmatprep.subr.mxu1 %v2109_v43 }
 0x431   : > { %986 = vmatpush1.msra.mxu1 %v2117_v44 }
 0x432   : > { %987 = vmatprep.subr.mxu1 %v2124_v45 }
 0x433   : > { %988 = vmatpush1.msra.mxu1 %v2131_v46 }
 0x434   : > { %989 = vmatprep.subr.mxu1 %v2138_v47 }
 0x435   : > { %990 = vmatpush1.msra.mxu1 %v2146_v48 }
 0x436   : > { %991 = vmatprep.subr.mxu1 %v2153_v49 }
 0x437   : > { %992 = vmatpush1.msra.mxu1 %v2160_v50 }
 0x438   : > { %993 = vmatprep.subr.mxu1 %v2167_v51 }
 0x439   : > { %994 = vmatpush1.msra.mxu1 %v2174_v52 }
 0x43a   : > { %995 = vmatprep.subr.mxu1 %v2181_v53 }
 0x43b   : > { %996 = vmatpush1.msra.mxu1 %v2188_v54 }
 0x43c   : > { %997 = vmatprep.subr.mxu1 %v2198_v55 }
 0x43d   : > { %998 = vmatpush1.msra.mxu1 %v2205_v56 }
 0x43e   : > { %1143 = vmatprep.subr.mxu1 %v1988_v24 }
 0x4de   : > { %v857_v58 = vpop.f32.mrf.mxu1 }
 0x4df   : > { %v858_v60 = vadd.f32 %v1588_v57, %v857_v58 }
 0x4e0   : > { %v859_v61 = vpop.f32.mrf.mxu1 }
 0x4e1   : > { %v2449_v62 = vadd.f32 %v1589_v59, %v859_v61  ;;  %944 = vmatmul.mubr.f32.vlgmr.msra.gmra.mxu0 %v858_v60 }
 0x4e2   : > { %1056 = vmatpush1.msra.mxu0 %v1993_v25  ;;  %1119 = vmatprep.mubr.f32.mxu0 %v1838_v28 }
 0x4e3   : > { %862 = vmax.xlane.f32.xlu1 %v2449_v62  ;;  %1057 = vmatprep.subr.mxu0 %v1998_v26 }
 0x4e4   : > { %1058 = vmatpush1.msra.mxu0 %v2004_v27 }
 0x4e5   : > { %1059 = vmatprep.subr.mxu0 %v2011_v29 }
 0x4e6   : > { %1060 = vmatpush1.msra.mxu0 %v2018_v30 }
 0x4e7   : > { %1061 = vmatprep.subr.mxu0 %v2025_v31 }
 0x4e8   : > { %1062 = vmatpush1.msra.mxu0 %v2032_v32 }
 0x4e9   : > { %1063 = vmatprep.subr.mxu0 %v2039_v33 }
 0x4ea   : > { %1064 = vmatpush1.msra.mxu0 %v2046_v34 }
 0x4eb   : > { %1065 = vmatprep.subr.mxu0 %v2053_v35 }
 0x4ec   : > { %1066 = vmatpush1.msra.mxu0 %v2060_v36 }
 0x4ed   : > { %1067 = vmatprep.subr.mxu0 %v2067_v37 }
 0x4ee   : > { %1068 = vmatpush1.msra.mxu0 %v2074_v38 }
 0x4ef   : > { %1069 = vmatprep.subr.mxu0 %v2081_v39 }
 0x4f0   : > { %1070 = vmatpush1.msra.mxu0 %v2088_v40 }
 0x4f1   : > { %1071 = vmatprep.subr.mxu0 %v2095_v41 }
 0x4f2   : > { %1072 = vmatpush1.msra.mxu0 %v2102_v42 }
 0x4f3   : > { %1073 = vmatprep.subr.mxu0 %v2109_v43 }
 0x4f4   : > { %1074 = vmatpush1.msra.mxu0 %v2117_v44 }
 0x4f5   : > { %1075 = vmatprep.subr.mxu0 %v2124_v45 }
 0x4f6   : > { %1076 = vmatpush1.msra.mxu0 %v2131_v46 }
 0x4f7   : > { %1077 = vmatprep.subr.mxu0 %v2138_v47 }
 0x4f8   : > { %1078 = vmatpush1.msra.mxu0 %v2146_v48 }
 0x4f9   : > { %1079 = vmatprep.subr.mxu0 %v2153_v49 }
 0x4fa   : > { %1080 = vmatpush1.msra.mxu0 %v2160_v50 }
 0x4fb   : > { %1081 = vmatprep.subr.mxu0 %v2167_v51 }
 0x4fc   : > { %1082 = vmatpush1.msra.mxu0 %v2174_v52 }
 0x4fd   : > { %1083 = vmatprep.subr.mxu0 %v2181_v53 }
 0x4fe   : > { %1084 = vmatpush1.msra.mxu0 %v2188_v54 }
 0x4ff   : > { %1085 = vmatprep.subr.mxu0 %v2198_v55 }
 0x500   : > { %1086 = vmatpush1.msra.mxu0 %v2205_v56 }
 0x501   : > { %1231 = vmatprep.subr.mxu0 %v1988_v24 }
 0x5a1   : > { %v945_v1 = vpop.f32.mrf.mxu0 }
 0x5a2   : > { %v946_v3 = vadd.f32 %v1591_v0, %v945_v1 }
 0x5a3   : > { %v947_v4 = vpop.f32.mrf.mxu0 }
 0x5a4   : > { %v2487_v6 = vadd.f32 %v1592_v2, %v947_v4  ;;  %1032 = vmatmul.mubr.f32.vlgmr.msra.gmra.mxu1 %v946_v3 }
 0x5a5   : > { %1144 = vmatpush1.msra.mxu1 %v1993_v25  ;;  %1207 = vmatprep.mubr.f32.mxu1 %v1838_v28 }
 0x5a6   : > { %950 = vmax.xlane.f32.xlu0 %v2487_v6  ;;  %1145 = vmatprep.subr.mxu1 %v1998_v26 }
 0x5a7   : > { %1146 = vmatpush1.msra.mxu1 %v2004_v27 }
 0x5a8   : > { %1147 = vmatprep.subr.mxu1 %v2011_v29 }
 0x5a9   : > { %1148 = vmatpush1.msra.mxu1 %v2018_v30 }
 0x5aa   : > { %1149 = vmatprep.subr.mxu1 %v2025_v31 }
 0x5ab   : > { %1150 = vmatpush1.msra.mxu1 %v2032_v32 }
 0x5ac   : > { %1151 = vmatprep.subr.mxu1 %v2039_v33 }
 0x5ad   : > { %1152 = vmatpush1.msra.mxu1 %v2046_v34 }
 0x5ae   : > { %1153 = vmatprep.subr.mxu1 %v2053_v35 }
 0x5af   : > { %1154 = vmatpush1.msra.mxu1 %v2060_v36 }
 0x5b0   : > { %1155 = vmatprep.subr.mxu1 %v2067_v37 }
 0x5b1   : > { %1156 = vmatpush1.msra.mxu1 %v2074_v38 }
 0x5b2   : > { %1157 = vmatprep.subr.mxu1 %v2081_v39 }
 0x5b3   : > { %1158 = vmatpush1.msra.mxu1 %v2088_v40 }
 0x5b4   : > { %1159 = vmatprep.subr.mxu1 %v2095_v41 }
 0x5b5   : > { %1160 = vmatpush1.msra.mxu1 %v2102_v42 }
 0x5b6   : > { %1161 = vmatprep.subr.mxu1 %v2109_v43 }
 0x5b7   : > { %1162 = vmatpush1.msra.mxu1 %v2117_v44 }
 0x5b8   : > { %1163 = vmatprep.subr.mxu1 %v2124_v45 }
 0x5b9   : > { %1164 = vmatpush1.msra.mxu1 %v2131_v46 }
 0x5ba   : > { %1165 = vmatprep.subr.mxu1 %v2138_v47 }
 0x5bb   : > { %1166 = vmatpush1.msra.mxu1 %v2146_v48 }
 0x5bc   : > { %1167 = vmatprep.subr.mxu1 %v2153_v49 }
 0x5bd   : > { %1168 = vmatpush1.msra.mxu1 %v2160_v50 }
 0x5be   : > { %1169 = vmatprep.subr.mxu1 %v2167_v51 }
 0x5bf   : > { %1170 = vmatpush1.msra.mxu1 %v2174_v52 }
 0x5c0   : > { %1171 = vmatprep.subr.mxu1 %v2181_v53 }
 0x5c1   : > { %1172 = vmatpush1.msra.mxu1 %v2188_v54 }
 0x5c2   : > { %1173 = vmatprep.subr.mxu1 %v2198_v55 }
 0x5c3   : > { %1174 = vmatpush1.msra.mxu1 %v2205_v56 }
 0x5c4   : > { %1319 = vmatprep.subr.mxu1 %v1988_v24  ;;  %v1597_v24 = vld [vmem:[%s2255_s24 + $0x80] sm:$0xff] }
 0x664   : > { %v1033_v8 = vpop.f32.mrf.mxu1 }
 0x665   : > { %v1034_v10 = vadd.f32 %v1594_v7, %v1033_v8 }
 0x666   : > { %v1035_v12 = vpop.f32.mrf.mxu1 }
 0x667   : > { %v2525_v13 = vadd.f32 %v1595_v9, %v1035_v12  ;;  %1120 = vmatmul.mubr.f32.vlgmr.msra.gmra.mxu0 %v1034_v10 }
 0x668   : > { %1232 = vmatpush1.msra.mxu0 %v1993_v25  ;;  %1295 = vmatprep.mubr.f32.mxu0 %v1838_v28 }
 0x669   : > { %1038 = vmax.xlane.f32.xlu1 %v2525_v13  ;;  %1233 = vmatprep.subr.mxu0 %v1998_v26 }
 0x66a   : > { %1234 = vmatpush1.msra.mxu0 %v2004_v27 }
 0x66b   : > { %1235 = vmatprep.subr.mxu0 %v2011_v29 }
 0x66c   : > { %1236 = vmatpush1.msra.mxu0 %v2018_v30 }
 0x66d   : > { %1237 = vmatprep.subr.mxu0 %v2025_v31 }
 0x66e   : > { %1238 = vmatpush1.msra.mxu0 %v2032_v32 }
 0x66f   : > { %1239 = vmatprep.subr.mxu0 %v2039_v33 }
 0x670   : > { %1240 = vmatpush1.msra.mxu0 %v2046_v34 }
 0x671   : > { %1241 = vmatprep.subr.mxu0 %v2053_v35 }
 0x672   : > { %1242 = vmatpush1.msra.mxu0 %v2060_v36 }
 0x673   : > { %1243 = vmatprep.subr.mxu0 %v2067_v37 }
 0x674   : > { %1244 = vmatpush1.msra.mxu0 %v2074_v38 }
 0x675   : > { %1245 = vmatprep.subr.mxu0 %v2081_v39 }
 0x676   : > { %1246 = vmatpush1.msra.mxu0 %v2088_v40 }
 0x677   : > { %1247 = vmatprep.subr.mxu0 %v2095_v41 }
 0x678   : > { %1248 = vmatpush1.msra.mxu0 %v2102_v42 }
 0x679   : > { %1249 = vmatprep.subr.mxu0 %v2109_v43 }
 0x67a   : > { %1250 = vmatpush1.msra.mxu0 %v2117_v44 }
 0x67b   : > { %1251 = vmatprep.subr.mxu0 %v2124_v45 }
 0x67c   : > { %1252 = vmatpush1.msra.mxu0 %v2131_v46 }
 0x67d   : > { %1253 = vmatprep.subr.mxu0 %v2138_v47 }
 0x67e   : > { %1254 = vmatpush1.msra.mxu0 %v2146_v48 }
 0x67f   : > { %1255 = vmatprep.subr.mxu0 %v2153_v49 }
 0x680   : > { %1256 = vmatpush1.msra.mxu0 %v2160_v50 }
 0x681   : > { %1257 = vmatprep.subr.mxu0 %v2167_v51 }
 0x682   : > { %1258 = vmatpush1.msra.mxu0 %v2174_v52 }
 0x683   : > { %1259 = vmatprep.subr.mxu0 %v2181_v53 }
 0x684   : > { %1260 = vmatpush1.msra.mxu0 %v2188_v54 }
 0x685   : > { %1261 = vmatprep.subr.mxu0 %v2198_v55 }
 0x686   : > { %1262 = vmatpush1.msra.mxu0 %v2205_v56 }
 0x727   : > { %v1121_v14 = vpop.f32.mrf.mxu0 }
 0x728   : > { %v1122_v16 = vadd.f32 %v1597_v24, %v1121_v14 }
 0x729   : > { %v1123_v18 = vpop.f32.mrf.mxu0 }
 0x72a   : > { %v2562_v19 = vadd.f32 %v1598_v15, %v1123_v18  ;;  %1208 = vmatmul.mubr.f32.vlgmr.msra.gmra.mxu1 %v1122_v16 }
 0x72b   : > { %1320 = vmatpush1.msra.mxu1 %v1993_v25  ;;  %1383 = vmatprep.mubr.f32.mxu1 %v1838_v28  ;;  %v1600_v25 = vld [vmem:[%s2255_s24 + $0x90] sm:$0xff] }
 0x72c   : > { %1126 = vmax.xlane.f32.xlu0 %v2562_v19  ;;  %1321 = vmatprep.subr.mxu1 %v1998_v26 }
 0x72d   : > { %1322 = vmatpush1.msra.mxu1 %v2004_v27  ;;  %v1601_v27 = vld [vmem:[%s2255_s24 + $0x98] sm:$0xff] }
 0x72e   : > { %1323 = vmatprep.subr.mxu1 %v2011_v29 }
 0x72f   : > { %1324 = vmatpush1.msra.mxu1 %v2018_v30 }
 0x730   : > { %1325 = vmatprep.subr.mxu1 %v2025_v31  ;;  %v424_v31 = vpop.xlane.xlu0 %423 }
 0x731   : > { %1326 = vmatpush1.msra.mxu1 %v2032_v32  ;;  %v425_v32 = vsub.f32 %v2259_v63, %v424_v31  ;;  %v1606_v31 = vld [vmem:[%s2255_s24 + $0xb0] sm:$0xff] }
 0x732   : > { %1327 = vmatprep.subr.mxu1 %v2039_v33 }
 0x733   : > { %1328 = vmatpush1.msra.mxu1 %v2046_v34  ;;  %v599_v34 = vpop.xlane.xlu1 %598 }
 0x734   : > { %1329 = vmatprep.subr.mxu1 %v2053_v35  ;;  %v2603_v33 = vpop.xlane.xlu0 %510  ;;  %v426_v35 = vmul.f32 1.442695, %v425_v32 }
 0x735   : > { %1330 = vmatpush1.msra.mxu1 %v2060_v36  ;;  %v600_v36 = vsub.f32 %v2335_v11, %v599_v34  ;;  %v2624_v16 = vsub.f32 %v2297_v5, %v2603_v33 }
 0x736   : > { %1331 = vmatprep.subr.mxu1 %v2067_v37  ;;  %1682 = vpow2.f32 %v426_v35 }
 0x737   : > { %1332 = vmatpush1.msra.mxu1 %v2074_v38  ;;  %v601_v38 = vmul.f32 1.442695, %v600_v36  ;;  %v687_v18 = vpop.xlane.xlu1 %686 }
 0x738   : > { %1333 = vmatprep.subr.mxu1 %v2081_v39  ;;  %v775_v37 = vpop.xlane.xlu0 %774 }
 0x739   : > { %1334 = vmatpush1.msra.mxu1 %v2088_v40  ;;  %v776_v39 = vsub.f32 %v2411_v23, %v775_v37  ;;  %1684 = vpow2.f32 %v601_v38 }
 0x73a   : > { %1335 = vmatprep.subr.mxu1 %v2095_v41  ;;  %v1603_v41 = vld [vmem:[%s2255_s24 + $0xa0] sm:$0xff] }
 0x73b   : > { %1336 = vmatpush1.msra.mxu1 %v2102_v42  ;;  %v777_v42 = vmul.f32 1.442695, %v776_v39 }
 0x73c   : > { %1337 = vmatprep.subr.mxu1 %v2109_v43  ;;  %v951_v40 = vpop.xlane.xlu0 %950 }
 0x73d   : > { %1338 = vmatpush1.msra.mxu1 %v2117_v44  ;;  %v952_v43 = vsub.f32 %v2487_v6, %v951_v40  ;;  %1686 = vpow2.f32 %v777_v42 }
 0x73e   : > { %1339 = vmatprep.subr.mxu1 %v2124_v45 }
 0x73f   : > { %1340 = vmatpush1.msra.mxu1 %v2131_v46  ;;  %v1604_v46 = vld [vmem:[%s2255_s24 + $0xa8] sm:$0xff] }
 0x740   : > { %1341 = vmatprep.subr.mxu1 %v2138_v47 }
 0x741   : > { %1342 = vmatpush1.msra.mxu1 %v2146_v48 }
 0x742   : > { %1343 = vmatprep.subr.mxu1 %v2153_v49  ;;  %v953_v49 = vmul.f32 1.442695, %v952_v43 }
 0x743   : > { %1344 = vmatpush1.msra.mxu1 %v2160_v50 }
 0x744   : > { %1345 = vmatprep.subr.mxu1 %v2167_v51  ;;  %1688 = vpow2.f32 %v953_v49 }
 0x745   : > { %1346 = vmatpush1.msra.mxu1 %v2174_v52 }
 0x746   : > { %1347 = vmatprep.subr.mxu1 %v2181_v53  ;;  %v1683_v53 = vpop.eup %1682 }
 0x747   : > { %1348 = vmatpush1.msra.mxu1 %v2188_v54  ;;  %v1685_v54 = vpop.eup %1684 }
 0x748   : > { %1349 = vmatprep.subr.mxu1 %v2198_v55 }
 0x749   : > { %1350 = vmatpush1.msra.mxu1 %v2205_v56 }
 0x74a   : > { %v1687_v55 = vpop.eup %1686 }
 0x751   : > { %v1689_v56 = vpop.eup %1688 }
 0x7b5   : > { %v1127_v44 = vpop.xlane.xlu0 %1126 }
 0x7b6   : > { %v1128_v50 = vsub.f32 %v2562_v19, %v1127_v44  ;;  %v513_v19 = vmul.f32 1.442695, %v2624_v16 }
 0x7b8   : > { %v1129_v52 = vmul.f32 1.442695, %v1128_v50 }
 0x7ba   : > { %1690 = vpow2.f32 %v1129_v52 }
 0x7c7   : > { %v1691_v63 = vpop.eup %1690 }
 0x7ea   : > { %v1209_v26 = vpop.f32.mrf.mxu1 }
 0x7eb   : > { %v1210_v28 = vadd.f32 %v1600_v25, %v1209_v26  ;;  %v2628_v25 = vsub.f32 %v2373_v17, %v687_v18  ;;  %v863_v26 = vpop.xlane.xlu1 %862  ;;  %v1607_v17 = vld [vmem:[%s2255_s24 + $0xb8] sm:$0xff] }
 0x7ec   : > { %v1211_v29 = vpop.f32.mrf.mxu1 }
 0x7ed   : > { %v2599_v30 = vadd.f32 %v1601_v27, %v1211_v29  ;;  %1296 = vmatmul.mubr.f32.vlgmr.msra.gmra.mxu0 %v1210_v28  ;;  %v689_v27 = vmul.f32 1.442695, %v2628_v25  ;;  %v2632_v28 = vsub.f32 %v2449_v62, %v863_v26 }
 0x7ef   : > { %1214 = vmax.xlane.f32.xlu1 %v2599_v30  ;;  %v1039_v29 = vpop.xlane.xlu1 %1038  ;;  %v865_v5 = vmul.f32 1.442695, %v2632_v28 }
 0x878   : > { %v1215_v33 = vpop.xlane.xlu1 %1214 }
 0x879   : > { %v1216_v62 = vsub.f32 %v2599_v30, %v1215_v33 }
 0x8ad   : > { %v1297_v45 = vpop.f32.mrf.mxu0 }
 0x8ae   : > { %v1298_v47 = vadd.f32 %v1603_v41, %v1297_v45 }
 0x8af   : > { %v1299_v48 = vpop.f32.mrf.mxu0 }
 0x8b0   : > { %v1300_v51 = vadd.f32 %v1604_v46, %v1299_v48  ;;  %1384 = vmatmul.mubr.f32.vlgmr.msra.gmra.mxu1 %v1298_v47 }
 0x8b2   : > { %1302 = vmax.xlane.f32.xlu0 %v1300_v51 }
 0x8b6   : > { %428 = vadd.xlane.f32.xlu0 %v1683_v53 }
 0x8ba   : > { %603 = vadd.xlane.f32.xlu0 %v1685_v54 }
 0x8be   : > { %779 = vadd.xlane.f32.xlu0 %v1687_v55 }
 0x8c2   : > { %955 = vadd.xlane.f32.xlu0 %v1689_v56 }
 0x8c6   : > { %1131 = vadd.xlane.f32.xlu0 %v1691_v63 }
 0x93b   : > { %v1303_v11 = vpop.xlane.xlu0 %1302 }
 0x93c   : > { %v2611_v20 = vsub.f32 %v1300_v51, %v1303_v11 }
 0x93e   : > { %v1305_v21 = vmul.f32 1.442695, %v2611_v20 }
 0x93f   : > { %v429_v22 = vpop.xlane.xlu0 %428 }
 0x940   : > { %1692 = vpow2.f32 %v1305_v21 }
 0x941   : > { %1694 = vlog2.f32 %v429_v22 }
 0x943   : > { %v604_v23 = vpop.xlane.xlu0 %603 }
 0x944   : > { %1696 = vlog2.f32 %v604_v23 }
 0x947   : > { %v780_v57 = vpop.xlane.xlu0 %779 }
 0x948   : > { %1698 = vlog2.f32 %v780_v57 }
 0x94b   : > { %v956_v58 = vpop.xlane.xlu0 %955 }
 0x94c   : > { %1700 = vlog2.f32 %v956_v58 }
 0x94d   : > { %v1693_v59 = vpop.eup %1692 }
 0x94e   : > { %v1695_v60 = vpop.eup %1694  ;;  %1307 = vadd.xlane.f32.xlu0 %v1693_v59 }
 0x94f   : > { %v431_v61 = vmul.f32 0.6931472, %v1695_v60  ;;  %v1132_v0 = vpop.xlane.xlu0 %1131 }
 0x950   : > { %1702 = vlog2.f32 %v1132_v0 }
 0x951   : > { %v1697_v1 = vpop.eup %1696  ;;  %v432_v2 = vsub.f32 %v425_v32, %v431_v61  ;;  %1704 = vpow2.f32 %v513_v19  ;;  %v2638_v32 = vsub.f32 %v2525_v13, %v1039_v29 }
 0x952   : > { %v606_v3 = vmul.f32 0.6931472, %v1697_v1  ;;  %1706 = vpow2.f32 %v689_v27 }
 0x953   : > { %433 = vst [vmem:[%s2615_s29] sm:$0xff] %v432_v2  ;;  %1708 = vpow2.f32 %v865_v5  ;;  %v1041_v37 = vmul.f32 1.442695, %v2638_v32 }
 0x954   : > { %v607_v4 = vsub.f32 %v600_v36, %v606_v3 }
 0x955   : > { %v1699_v6 = vpop.eup %1698  ;;  %1710 = vpow2.f32 %v1041_v37 }
 0x956   : > { %1581 = vst [vmem:[%s2615_s29 + $0x10] sm:$0xff] %v607_v4  ;;  %v782_v7 = vmul.f32 0.6931472, %v1699_v6 }
 0x958   : > { %v783_v8 = vsub.f32 %v776_v39, %v782_v7  ;;  %v1217_v39 = vmul.f32 1.442695, %v1216_v62 }
 0x959   : > { %v1701_v9 = vpop.eup %1700 }
 0x95a   : > { %1587 = vst [vmem:[%s2615_s29 + $0x20] sm:$0xff] %v783_v8  ;;  %v958_v10 = vmul.f32 0.6931472, %v1701_v9  ;;  %1712 = vpow2.f32 %v1217_v39 }
 0x95c   : > { %v959_v12 = vsub.f32 %v952_v43, %v958_v10 }
 0x95d   : > { %v1703_v24 = vpop.eup %1702 }
 0x95e   : > { %1593 = vst [vmem:[%s2615_s29 + $0x30] sm:$0xff] %v959_v12  ;;  %v1134_v14 = vmul.f32 0.6931472, %v1703_v24  ;;  %v1705_v13 = vpop.eup %1704 }
 0x95f   : > { %v1707_v40 = vpop.eup %1706 }
 0x960   : > { %v1135_v15 = vsub.f32 %v1128_v50, %v1134_v14  ;;  %v1709_v41 = vpop.eup %1708 }
 0x962   : > { %1599 = vst [vmem:[%s2615_s29 + $0x40] sm:$0xff] %v1135_v15  ;;  %v1711_v42 = vpop.eup %1710 }
 0x967   : > { %v1713_v43 = vpop.eup %1712 }
 0x970   : > { %v1385_v34 = vpop.f32.mrf.mxu1 }
 0x971   : > { %v1386_v35 = vadd.f32 %v1606_v31, %v1385_v34 }
 0x972   : > { %v1387_v36 = vpop.f32.mrf.mxu1 }
 0x973   : > { %1407 = vst [vmem:[%s2643_s5] sm:$0xff] %v1386_v35  ;;  %v1388_v38 = vadd.f32 %v1607_v17, %v1387_v36 }
 0x975   : > { %1390 = vmax.xlane.f32.xlu1 %v1388_v38 }
 0x979   : > { %515 = vadd.xlane.f32.xlu1 %v1705_v13 }
 0x97d   : > { %691 = vadd.xlane.f32.xlu1 %v1707_v40 }
 0x981   : > { %867 = vadd.xlane.f32.xlu1 %v1709_v41 }
 0x985   : > { %1043 = vadd.xlane.f32.xlu1 %v1711_v42 }
 0x989   : > { %1219 = vadd.xlane.f32.xlu1 %v1713_v43 }
 0x9d7   : > { %v1308_v30 = vpop.xlane.xlu0 %1307 }
 0x9d8   : > { %1714 = vlog2.f32 %v1308_v30 }
 0x9e5   : > { %v1715_v44 = vpop.eup %1714 }
 0x9e6   : > { %v1310_v45 = vmul.f32 0.6931472, %v1715_v44 }
 0x9e8   : > { %v1311_v46 = vsub.f32 %v2611_v20, %v1310_v45 }
 0x9ea   : > { %1605 = vst [vmem:[%s2615_s29 + $0x50] sm:$0xff] %v1311_v46 }
 0x9fe   : > { %v1391_v47 = vpop.xlane.xlu1 %1390 }
 0x9ff   : > { %v2648_v48 = vsub.f32 %v1388_v38, %v1391_v47 }
 0xa01   : > { %v1393_v49 = vmul.f32 1.442695, %v2648_v48 }
 0xa02   : > { %v516_v50 = vpop.xlane.xlu1 %515 }
 0xa03   : > { %1716 = vpow2.f32 %v1393_v49 }
 0xa04   : > { %1718 = vlog2.f32 %v516_v50 }
 0xa06   : > { %v692_v51 = vpop.xlane.xlu1 %691 }
 0xa07   : > { %1720 = vlog2.f32 %v692_v51 }
 0xa0a   : > { %v868_v52 = vpop.xlane.xlu1 %867 }
 0xa0b   : > { %1722 = vlog2.f32 %v868_v52 }
 0xa0e   : > { %v1044_v53 = vpop.xlane.xlu1 %1043 }
 0xa0f   : > { %1724 = vlog2.f32 %v1044_v53 }
 0xa10   : > { %v1717_v54 = vpop.eup %1716 }
 0xa11   : > { %v1719_v55 = vpop.eup %1718  ;;  %1395 = vadd.xlane.f32.xlu1 %v1717_v54 }
 0xa12   : > { %v518_v56 = vmul.f32 0.6931472, %v1719_v55  ;;  %v1220_v63 = vpop.xlane.xlu1 %1219 }
 0xa13   : > { %1726 = vlog2.f32 %v1220_v63 }
 0xa14   : > { %v1721_v11 = vpop.eup %1720  ;;  %v519_v20 = vsub.f32 %v2624_v16, %v518_v56 }
 0xa15   : > { %v694_v21 = vmul.f32 0.6931472, %v1721_v11 }
 0xa16   : > { %1578 = vst [vmem:[%s2615_s29 + $0x8] sm:$0xff] %v519_v20 }
 0xa17   : > { %v695_v22 = vsub.f32 %v2628_v25, %v694_v21 }
 0xa18   : > { %v1723_v23 = vpop.eup %1722 }
 0xa19   : > { %1584 = vst [vmem:[%s2615_s29 + $0x18] sm:$0xff] %v695_v22  ;;  %v870_v57 = vmul.f32 0.6931472, %v1723_v23 }
 0xa1b   : > { %v871_v58 = vsub.f32 %v2632_v28, %v870_v57 }
 0xa1c   : > { %v1725_v59 = vpop.eup %1724 }
 0xa1d   : > { %1590 = vst [vmem:[%s2615_s29 + $0x28] sm:$0xff] %v871_v58  ;;  %v1046_v60 = vmul.f32 0.6931472, %v1725_v59 }
 0xa1f   : > { %v1047_v61 = vsub.f32 %v2638_v32, %v1046_v60 }
 0xa20   : > { %v1727_v0 = vpop.eup %1726 }
 0xa21   : > { %1596 = vst [vmem:[%s2615_s29 + $0x38] sm:$0xff] %v1047_v61  ;;  %v1222_v1 = vmul.f32 0.6931472, %v1727_v0 }
 0xa23   : > { %v1223_v2 = vsub.f32 %v1216_v62, %v1222_v1 }
 0xa25   : > { %1602 = vst [vmem:[%s2615_s29 + $0x48] sm:$0xff] %v1223_v2 }
 0xa26   : > { %1743 = shalt.err (!%p1740_p8)
}
 0xa27   : > { %s1744_s24 = scalar_lea.hbm %s1443_s9, 128  ;;  %s1748_s5 = scalar_lea.hbm %s2742_s4, 256 }
 0xa28   : > { %p1745_p11 = scmp.ne.s32.totalorder %s1443_s9, %s1744_s24  ;;  %p1749_p0 = scmp.lt.s32.totalorder %s1443_s9, %s2742_s4 }
 0xa29   : > { %p1750_p1 = scmp.lt.s32.totalorder %s1748_s5, %s1744_s24 }
 0xa2a   : > { %p1746_p12 = pnand %p1745_p11, %p1908_p5 }
 0xa2b   : > { %p1751_p2 = por %p1750_p1, %p1749_p0 }
 0xa2c   : > { %p1747_p13 = pneg %p1746_p12 }
 0xa2e   : > { %p1752_p10 = pnand %p1751_p2, %p1747_p13 }
 0xa30   : > { %1755 = shalt.err (!%p1752_p10)
}
 0xa31   : > { %1619 = dma.vmem_to_hbm [thread:$0]  (%p1908_p5), %s1446_s10, 128, %s1443_s9, %s1414_s11  }
 0xa32   : > { %s1429_s12 = sshll.u32 %s2615_s29, 4  ;;  %s2686_s22 = scalar_lea.hbm %s2741_s3, %s1610_s6  ;;  %s2688_s12 = int_to_ptr.vmem [resolvable:$true] %s1429_s12 }
 0xa33   : > { %s1409_s9 = scalar_lea.sflag [#allocation5], %s2252_s21  ;;  %s1756_s10 = scalar_lea.vmem %s2688_s12, 1536 }
 0xa34   : > { %p1757_p10 = scmp.ne.s32.totalorder %s2688_s12, %s1756_s10  ;;  %s1840_s18 = smov [#allocation4]  }
 0xa35   : > { %s1760_s11 = sshll.u32 %s1840_s18, 4  ;;  %s1761_s11 = int_to_ptr.vmem [resolvable:$false] %s1760_s11 }
 0xa36   : > { %p1758_p3 = pnand %p1757_p10, %p1908_p5  ;;  %s1762_s24 = scalar_lea.vmem %s1761_s11, 3072 }
 0xa37   : > { %p1763_p6 = scmp.lt.s32.totalorder %s2688_s12, %s1761_s11  ;;  %p1764_p7 = scmp.lt.s32.totalorder %s1762_s24, %s1756_s10 }
 0xa38   : > { %p1759_p4 = pneg %p1758_p3 }
 0xa39   : > { %p1765_p8 = por %p1764_p7, %p1763_p6 }
 0xa3b   : > { %p1766_p11 = pnand %p1765_p8, %p1759_p4 }
 0xa9a   : > { %v1396_v3 = vpop.xlane.xlu1 %1395 }
 0xa9b   : > { %1728 = vlog2.f32 %v1396_v3 }
 0xaa8   : > { %v1729_v4 = vpop.eup %1728 }
 0xaa9   : > { %v1398_v6 = vmul.f32 0.6931472, %v1729_v4 }
 0xaab   : > { %v1399_v7 = vsub.f32 %v2648_v48, %v1398_v6 }
 0xaad   : > { %1608 = vst [vmem:[%s2615_s29 + $0x58] sm:$0xff] %v1399_v7 }
 0xaae   : > { %1769 = shalt.err (!%p1766_p11)
}
 0xaaf   : > { %s1770_s29 = scalar_lea.hbm %s2686_s22, 1536  ;;  %s1774_s30 = scalar_lea.hbm %s2741_s3, 3072 }
 0xab0   : > { %p1771_p12 = scmp.ne.s32.totalorder %s2686_s22, %s1770_s29  ;;  %p1775_p1 = scmp.lt.s32.totalorder %s2686_s22, %s2741_s3 }
 0xab1   : > { %p1776_p2 = scmp.lt.s32.totalorder %s1774_s30, %s1770_s29 }
 0xab2   : > { %p1772_p13 = pnand %p1771_p12, %p1908_p5 }
 0xab3   : > { %p1777_p10 = por %p1776_p2, %p1775_p1 }
 0xab4   : > { %p1773_p0 = pneg %p1772_p13 }
 0xab6   : > { %p1778_p3 = pnand %p1777_p10, %p1773_p0 }
 0xab8   : > { %1781 = shalt.err (!%p1778_p3)
}
 0xab9   : > { %s1841_s8 = smov 128   ;;  %s1842_s13 = smov 256  }
 0xaba   : > { %s1843_s14 = smov 8  }
 0xabb   : > { %1618 = dma.vmem_to_hbm [thread:$0]  (%p1908_p5), %s2688_s12, 1536, %s2686_s22, %s1409_s9, %s1841_s8, %s1842_s13, %s1843_s14  }
 0xabc PF: > { %s1457_s10 = sand.u32 1, %s1816_s15   ;;  %p2746_p4 = scmp.ge.s32.totalorder %s1836_s20, 2 }
 0xabd   : > { %s1458_s18 = scalar_lea.sflag [#allocation5], %s1457_s10 }
 0xabe   : > { %p1623_p6 = pnand %p2746_p4, %p1919_p9 }
 0xac0   : > { %p1624_p7 = pneg %p1623_p6 }
 0xac2   : > { %1807 = dma.done.wait (%p1624_p7), %s1458_s18, 1536  }
 0xac3   : > { %1809 = vsyncadd (%p1624_p7), %s1458_s18, 4294965760  ;;  %s1467_s11 = scalar_lea.sflag [#allocation7], %s1457_s10 }
 0xac4   : > { %1811 = dma.done.wait (%p1624_p7), %s1467_s11, 128  }
 0xac5   : > { %1813 = vsyncadd (%p1624_p7), %s1467_s11, 4294967168  ;;  %s21_s20 = sadd.s32 1, %s1836_s20   ;;  %s2747_s15 = smov %s1820_s16 }
 0xac6   : > { %p18_p8 = scmp.ge.s32.totalorder %s21_s20, 4   ;;  %s2748_s16 = smov %s1824_s17 }
 0xac7   : > { %s2749_s17 = smov %s1917_s27  ;;  %s2750_s18 = smov %s1832_s19 }
 0xac8   : > { %s2751_s19 = smov %s2753_s23  ;;  %20 = sbr.rel (!%p18_p8) target bundleno = 6 (0x6), region = 145 }
 0xacd   :  { %1472 = vsyncpa [#allocation5], 1 }
 0xace   :  { %1474 = vsyncpa [#allocation5 + $0x1], 1 }
 0xacf   :  { %1475 = vsyncpa [#allocation7], 1 }
 0xad0   :  { %1477 = vsyncpa [#allocation7 + $0x1], 1 }

</bundles_post_ra>
